<compile_context>
chip_gen: v6e
topology: v6e:2x2x1
jax: 0.10.0
libtpu: 0.0.40
codegen_flags: <defaults>
</compile_context>

<pallas_src>
import functools

import jax
import jax.numpy as jnp
from jax.experimental import pallas as pl
from jax.experimental.pallas import tpu as pltpu


def _round_up(x, m):
    return ((x + m - 1) // m) * m


def _pick_time_chunk(T, max_chunk=16):
    """Largest divisor of T that is <= max_chunk (falls back to 1)."""
    tc = 1
    for d in range(1, min(T, max_chunk) + 1):
        if T % d == 0:
            tc = d
    return tc


# ----------------------------------------------------------------------------
# Kernel 1: tiled input projection   gi_d = x @ W_ih_d^T + b_ih_d   (d = f, b)
# ----------------------------------------------------------------------------
def _proj_kernel(x_ref, wf_ref, wb_ref, bf_ref, bb_ref, of_ref, ob_ref):
    x = x_ref[...].astype(jnp.bfloat16)          # in-kernel cast, no HBM copy
    accf = jnp.dot(x, wf_ref[...], preferred_element_type=jnp.float32)
    accb = jnp.dot(x, wb_ref[...], preferred_element_type=jnp.float32)
    of_ref[...] = (accf + bf_ref[...]).astype(of_ref.dtype)
    ob_ref[...] = (accb + bb_ref[...]).astype(ob_ref.dtype)


def input_projection(x2d, w_f, w_b, b_f, b_b, tm=512):
    """(M,K)@(K,3H)+b for both directions; bf16 MXU, f32 acc, bf16 outputs."""
    M, K = x2d.shape
    N = w_f.shape[1]
    tm = min(tm, _round_up(M, 8))
    Mp = _round_up(M, tm)
    if Mp != M:
        x2d = jnp.pad(x2d, ((0, Mp - M), (0, 0)))
    # TODO(synk): K-tiling omitted; K = n_in is small enough to keep the
    #             whole weight tile resident.
    gi_f, gi_b = pl.pallas_call(
        _proj_kernel,
        out_shape=(jax.ShapeDtypeStruct((Mp, N), jnp.bfloat16),
                   jax.ShapeDtypeStruct((Mp, N), jnp.bfloat16)),
        grid=(Mp // tm,),
        in_specs=[
            pl.BlockSpec((tm, K), lambda i: (i, 0)),
            pl.BlockSpec((K, N), lambda i: (0, 0)),
            pl.BlockSpec((K, N), lambda i: (0, 0)),
            pl.BlockSpec((1, N), lambda i: (0, 0)),
            pl.BlockSpec((1, N), lambda i: (0, 0)),
        ],
        out_specs=(pl.BlockSpec((tm, N), lambda i: (i, 0)),
                   pl.BlockSpec((tm, N), lambda i: (i, 0))),
        compiler_params=pltpu.CompilerParams(
            dimension_semantics=("parallel",)),
    )(x2d, w_f.astype(jnp.bfloat16), w_b.astype(jnp.bfloat16),
      b_f.astype(jnp.float32), b_b.astype(jnp.float32))
    if Mp != M:
        gi_f = gi_f[:M]
        gi_b = gi_b[:M]
    return gi_f, gi_b


# ----------------------------------------------------------------------------
# Kernel 2: bidirectional GRU time recurrence, chunked over time
# ----------------------------------------------------------------------------
def _bigru_rec_kernel(gif_ref, gib_ref, whf_ref, whb_ref, bhf_ref, bhb_ref,
                      of_ref, ob_ref, hf_ref, hb_ref, *, H, Tc):
    """One chunk of Tc timesteps for both directions.

    gif_ref: (Tc, B, 3H) bf16  input gates, fwd dir, times [c*Tc, (c+1)*Tc)
    gib_ref: (Tc, B, 3H) bf16  input gates, bwd dir, times [T-(c+1)*Tc, T-c*Tc)
    whf/whb: (H, 3H) bf16      per-direction W_hh^T
    bhf/bhb: (1, 3H) f32       per-direction b_hh
    of_ref : (Tc, B, H) f32    forward outputs for this chunk
    ob_ref : (Tc, B, H) f32    backward outputs for this chunk (reversed block)
    hf/hb_ref: (B, H) f32      VMEM hidden-state carry across grid steps
    """
    c = pl.program_id(0)

    @pl.when(c == 0)
    def _():
        hf_ref[...] = jnp.zeros_like(hf_ref)
        hb_ref[...] = jnp.zeros_like(hb_ref)

    # Hoist constant operands out of the step loop.
    whf = whf_ref[...]
    whb = whb_ref[...]
    bhf = bhf_ref[...]
    bhb = bhb_ref[...]

    def gru_cell(gi, gh, h_prev):
        # PyTorch gate order: r, z, n ; b_hn stays inside the r * (.) term.
        r = jax.nn.sigmoid(gi[:, 0:H] + gh[:, 0:H])
        z = jax.nn.sigmoid(gi[:, H:2 * H] + gh[:, H:2 * H])
        n = jnp.tanh(gi[:, 2 * H:3 * H] + r * gh[:, 2 * H:3 * H])
        return (1.0 - z) * n + z * h_prev

    def step(i, carry):
        hf, hb = carry                                   # (B, H) f32 each
        gif = gif_ref[i].astype(jnp.float32)             # fwd time c*Tc + i
        gib = gib_ref[Tc - 1 - i].astype(jnp.float32)    # bwd time T-1-(c*Tc+i)
        ghf = jnp.dot(hf.astype(jnp.bfloat16), whf,
                      preferred_element_type=jnp.float32) + bhf
        ghb = jnp.dot(hb.astype(jnp.bfloat16), whb,
                      preferred_element_type=jnp.float32) + bhb
        hf = gru_cell(gif, ghf, hf)
        hb = gru_cell(gib, ghb, hb)
        of_ref[i] = hf
        ob_ref[Tc - 1 - i] = hb
        return hf, hb

    hf, hb = jax.lax.fori_loop(0, Tc, step, (hf_ref[...], hb_ref[...]),
                               unroll=True)
    hf_ref[...] = hf
    hb_ref[...] = hb


def bigru_recurrence(gi_f, gi_b, whh_f, whh_b, bhh_f, bhh_b, H):
    T, B, _ = gi_f.shape
    Tc = _pick_time_chunk(T)
    nchunks = T // Tc
    kern = functools.partial(_bigru_rec_kernel, H=H, Tc=Tc)
    # NOTE: whh/bhh blocks have constant index maps; Pallas skips re-fetching
    # unchanged blocks, and the bf16 per-direction weights keep the (default
    # double-buffered) resident footprint small.
    out_f, out_b = pl.pallas_call(
        kern,
        out_shape=(jax.ShapeDtypeStruct((T, B, H), jnp.float32),
                   jax.ShapeDtypeStruct((T, B, H), jnp.float32)),
        grid=(nchunks,),
        in_specs=[
            pl.BlockSpec((Tc, B, 3 * H), lambda c: (c, 0, 0)),
            pl.BlockSpec((Tc, B, 3 * H), lambda c: (nchunks - 1 - c, 0, 0)),
            pl.BlockSpec((H, 3 * H), lambda c: (0, 0)),
            pl.BlockSpec((H, 3 * H), lambda c: (0, 0)),
            pl.BlockSpec((1, 3 * H), lambda c: (0, 0)),
            pl.BlockSpec((1, 3 * H), lambda c: (0, 0)),
        ],
        out_specs=(pl.BlockSpec((Tc, B, H), lambda c: (c, 0, 0)),
                   pl.BlockSpec((Tc, B, H), lambda c: (nchunks - 1 - c, 0, 0))),
        scratch_shapes=[pltpu.VMEM((B, H), jnp.float32),
                        pltpu.VMEM((B, H), jnp.float32)],
        compiler_params=pltpu.CompilerParams(
            dimension_semantics=("arbitrary",)),   # sequential carry over time
    )(gi_f, gi_b,
      whh_f.astype(jnp.bfloat16), whh_b.astype(jnp.bfloat16),
      bhh_f.astype(jnp.float32), bhh_b.astype(jnp.float32))
    return out_f, out_b


# ----------------------------------------------------------------------------
# BiGRU forward
# ----------------------------------------------------------------------------
def bigru_forward(params, x):
    """x: (B, T, n_in) -> (B, T, 2*H), matching nn.GRU(bidirectional, batch_first)."""
    B, T, n_in = x.shape
    H = params["weight_hh_l0"].shape[1]

    # Time-major rows for the lane-dense projection.
    xt = x.transpose(1, 0, 2).reshape(T * B, n_in)

    w_ih_f = params["weight_ih_l0"].T            # (n_in, 3H)
    w_ih_b = params["weight_ih_l0_reverse"].T    # (n_in, 3H)
    b_ih_f = params["bias_ih_l0"].reshape(1, -1)
    b_ih_b = params["bias_ih_l0_reverse"].reshape(1, -1)

    gi_f, gi_b = input_projection(xt, w_ih_f, w_ih_b, b_ih_f, b_ih_b)
    gi_f = gi_f.reshape(T, B, 3 * H)
    gi_b = gi_b.reshape(T, B, 3 * H)

    whh_f = params["weight_hh_l0"].T             # (H, 3H)
    whh_b = params["weight_hh_l0_reverse"].T     # (H, 3H)
    bhh_f = params["bias_hh_l0"].reshape(1, -1)
    bhh_b = params["bias_hh_l0_reverse"].reshape(1, -1)

    out_f, out_b = bigru_recurrence(gi_f, gi_b, whh_f, whh_b, bhh_f, bhh_b, H)
    # Single fused concat + transpose pass over the output.
    return jnp.concatenate([out_f, out_b], axis=-1).transpose(1, 0, 2)


# ----------------------------------------------------------------------------
# Parameters (PyTorch nn.GRU layout: uniform(-1/sqrt(H), 1/sqrt(H)))
# ----------------------------------------------------------------------------
def init_params(key, n_in, n_hidden):
    H = n_hidden
    bound = 1.0 / float(jnp.sqrt(jnp.float32(H)))
    ks = jax.random.split(key, 8)

    def u(k, shape):
        return jax.random.uniform(k, shape, jnp.float32, -bound, bound)

    return dict(
        weight_ih_l0=u(ks[0], (3 * H, n_in)),
        weight_hh_l0=u(ks[1], (3 * H, H)),
        bias_ih_l0=u(ks[2], (3 * H,)),
        bias_hh_l0=u(ks[3], (3 * H,)),
        weight_ih_l0_reverse=u(ks[4], (3 * H, n_in)),
        weight_hh_l0_reverse=u(ks[5], (3 * H, H)),
        bias_ih_l0_reverse=u(ks[6], (3 * H,)),
        bias_hh_l0_reverse=u(ks[7], (3 * H,)),
    )


# ----------------------------------------------------------------------------
if __name__ == "__main__":
    key = jax.random.PRNGKey(0)
    k_x, k_p = jax.random.split(key)

    B, T, n_in, n_hidden = 2, 8, 16, 32
    x = jax.random.normal(k_x, (B, T, n_in), jnp.float32)
    params = init_params(k_p, n_in, n_hidden)

    out = jax.jit(bigru_forward)(params, x)
    out = jax.block_until_ready(out)

    assert out.shape == (B, T, 2 * n_hidden), out.shape
    assert bool(jnp.all(jnp.isfinite(out)))
    print("KERNEL_OK")
</pallas_src>

<mosaic_0001>
module attributes {stable_mosaic.version = 11 : i64} {
  func.func @_proj_kernel(%arg0: i32, %arg1: memref<16x16xf32, #tpu.memory_space<vmem>>, %arg2: memref<16x96xbf16, #tpu.memory_space<vmem>>, %arg3: memref<16x96xbf16, #tpu.memory_space<vmem>>, %arg4: memref<1x96xf32, #tpu.memory_space<vmem>>, %arg5: memref<1x96xf32, #tpu.memory_space<vmem>>, %arg6: memref<16x96xbf16, #tpu.memory_space<vmem>>, %arg7: memref<16x96xbf16, #tpu.memory_space<vmem>>) attributes {dimension_semantics = [#tpu.dimension_semantics<parallel>], iteration_bounds = array<i64: 1>, scalar_prefetch = 0 : i64, scratch_operands = 0 : i64, tpu.core_type = #tpu.core_type<tc>, window_params = [{transform_indices = @transform_0, window_bounds = array<i64: 16, 16>}, {pipeline_mode = #tpu.pipeline_mode<synchronous>, transform_indices = @transform_1, window_bounds = array<i64: 16, 96>}, {pipeline_mode = #tpu.pipeline_mode<synchronous>, transform_indices = @transform_2, window_bounds = array<i64: 16, 96>}, {pipeline_mode = #tpu.pipeline_mode<synchronous>, transform_indices = @transform_3, window_bounds = array<i64: 1, 96>}, {pipeline_mode = #tpu.pipeline_mode<synchronous>, transform_indices = @transform_4, window_bounds = array<i64: 1, 96>}, {transform_indices = @transform_5, window_bounds = array<i64: 16, 96>}, {transform_indices = @transform_6, window_bounds = array<i64: 16, 96>}]} {
    %c0 = arith.constant 0 : index
    %c0_0 = arith.constant 0 : index
    %0 = vector.load %arg1[%c0, %c0_0] : memref<16x16xf32, #tpu.memory_space<vmem>>, vector<16x16xf32>
    %1 = arith.truncf %0 : vector<16x16xf32> to vector<16x16xbf16>
    %c0_1 = arith.constant 0 : index
    %c0_2 = arith.constant 0 : index
    %2 = vector.load %arg2[%c0_1, %c0_2] : memref<16x96xbf16, #tpu.memory_space<vmem>>, vector<16x96xbf16>
    %cst = arith.constant dense<0.000000e+00> : vector<16x96xf32>
    %3 = tpu.matmul %1, %2, %cst {dimension_numbers = #tpu.dot_dimension_numbers<[1], [0], [0], [1], [0, 0, 1, 1], [], []>} : vector<16x16xbf16>, vector<16x96xbf16>, vector<16x96xf32> -> vector<16x96xf32>
    %c0_3 = arith.constant 0 : index
    %c0_4 = arith.constant 0 : index
    %4 = vector.load %arg3[%c0_3, %c0_4] : memref<16x96xbf16, #tpu.memory_space<vmem>>, vector<16x96xbf16>
    %cst_5 = arith.constant dense<0.000000e+00> : vector<16x96xf32>
    %5 = tpu.matmul %1, %4, %cst_5 {dimension_numbers = #tpu.dot_dimension_numbers<[1], [0], [0], [1], [0, 0, 1, 1], [], []>} : vector<16x16xbf16>, vector<16x96xbf16>, vector<16x96xf32> -> vector<16x96xf32>
    %c0_6 = arith.constant 0 : index
    %c0_7 = arith.constant 0 : index
    %6 = vector.load %arg4[%c0_6, %c0_7] : memref<1x96xf32, #tpu.memory_space<vmem>>, vector<1x96xf32>
    %7 = vector.broadcast %6 : vector<1x96xf32> to vector<16x96xf32>
    %8 = arith.addf %3, %7 : vector<16x96xf32>
    %9 = arith.truncf %8 : vector<16x96xf32> to vector<16x96xbf16>
    %c0_8 = arith.constant 0 : index
    %c0_9 = arith.constant 0 : index
    %10 = vector.load %arg6[%c0_8, %c0_9] : memref<16x96xbf16, #tpu.memory_space<vmem>>, vector<16x96xbf16>
    tpu.vector_store %arg6[%c0_8, %c0_9], %9 {strides = array<i32>} : memref<16x96xbf16, #tpu.memory_space<vmem>>, vector<16x96xbf16>,
    %c0_10 = arith.constant 0 : index
    %c0_11 = arith.constant 0 : index
    %11 = vector.load %arg5[%c0_10, %c0_11] : memref<1x96xf32, #tpu.memory_space<vmem>>, vector<1x96xf32>
    %12 = vector.broadcast %11 : vector<1x96xf32> to vector<16x96xf32>
    %13 = arith.addf %5, %12 : vector<16x96xf32>
    %14 = arith.truncf %13 : vector<16x96xf32> to vector<16x96xbf16>
    %c0_12 = arith.constant 0 : index
    %c0_13 = arith.constant 0 : index
    %15 = vector.load %arg7[%c0_12, %c0_13] : memref<16x96xbf16, #tpu.memory_space<vmem>>, vector<16x96xbf16>
    tpu.vector_store %arg7[%c0_12, %c0_13], %14 {strides = array<i32>} : memref<16x96xbf16, #tpu.memory_space<vmem>>, vector<16x96xbf16>,
    return
  }
  func.func @transform_0(%arg0: i32) -> (i32, i32) {
    %c0_i32 = arith.constant 0 : i32
    %c0_i32_0 = arith.constant 0 : i32
    return %arg0, %c0_i32 : i32, i32
  }
  func.func @transform_1(%arg0: i32) -> (i32, i32) {
    %c0_i32 = arith.constant 0 : i32
    %c0_i32_0 = arith.constant 0 : i32
    %c0_i32_1 = arith.constant 0 : i32
    return %c0_i32, %c0_i32_0 : i32, i32
  }
  func.func @transform_2(%arg0: i32) -> (i32, i32) {
    %c0_i32 = arith.constant 0 : i32
    %c0_i32_0 = arith.constant 0 : i32
    %c0_i32_1 = arith.constant 0 : i32
    return %c0_i32, %c0_i32_0 : i32, i32
  }
  func.func @transform_3(%arg0: i32) -> (i32, i32) {
    %c0_i32 = arith.constant 0 : i32
    %c0_i32_0 = arith.constant 0 : i32
    %c0_i32_1 = arith.constant 0 : i32
    return %c0_i32, %c0_i32_0 : i32, i32
  }
  func.func @transform_4(%arg0: i32) -> (i32, i32) {
    %c0_i32 = arith.constant 0 : i32
    %c0_i32_0 = arith.constant 0 : i32
    %c0_i32_1 = arith.constant 0 : i32
    return %c0_i32, %c0_i32_0 : i32, i32
  }
  func.func @transform_5(%arg0: i32) -> (i32, i32) {
    %c0_i32 = arith.constant 0 : i32
    %c0_i32_0 = arith.constant 0 : i32
    return %arg0, %c0_i32 : i32, i32
  }
  func.func @transform_6(%arg0: i32) -> (i32, i32) {
    %c0_i32 = arith.constant 0 : i32
    %c0_i32_0 = arith.constant 0 : i32
    return %arg0, %c0_i32 : i32, i32
  }
}

module attributes {stable_mosaic.version = 11 : i64} {
  func.func @_bigru_rec_kernel(%arg0: i32, %arg1: memref<8x2x96xbf16, #tpu.memory_space<vmem>>, %arg2: memref<8x2x96xbf16, #tpu.memory_space<vmem>>, %arg3: memref<32x96xbf16, #tpu.memory_space<vmem>>, %arg4: memref<32x96xbf16, #tpu.memory_space<vmem>>, %arg5: memref<1x96xf32, #tpu.memory_space<vmem>>, %arg6: memref<1x96xf32, #tpu.memory_space<vmem>>, %arg7: memref<8x2x32xf32, #tpu.memory_space<vmem>>, %arg8: memref<8x2x32xf32, #tpu.memory_space<vmem>>, %arg9: memref<2x32xf32, #tpu.memory_space<vmem>>, %arg10: memref<2x32xf32, #tpu.memory_space<vmem>>) attributes {dimension_semantics = [#tpu.dimension_semantics<arbitrary>], iteration_bounds = array<i64: 1>, scalar_prefetch = 0 : i64, scratch_operands = 2 : i64, tpu.core_type = #tpu.core_type<tc>, window_params = [{transform_indices = @transform_0, window_bounds = array<i64: 8, 2, 96>}, {transform_indices = @transform_1, window_bounds = array<i64: 8, 2, 96>}, {pipeline_mode = #tpu.pipeline_mode<synchronous>, transform_indices = @transform_2, window_bounds = array<i64: 32, 96>}, {pipeline_mode = #tpu.pipeline_mode<synchronous>, transform_indices = @transform_3, window_bounds = array<i64: 32, 96>}, {pipeline_mode = #tpu.pipeline_mode<synchronous>, transform_indices = @transform_4, window_bounds = array<i64: 1, 96>}, {pipeline_mode = #tpu.pipeline_mode<synchronous>, transform_indices = @transform_5, window_bounds = array<i64: 1, 96>}, {transform_indices = @transform_6, window_bounds = array<i64: 8, 2, 32>}, {transform_indices = @transform_7, window_bounds = array<i64: 8, 2, 32>}]} {
    %c0_i32 = arith.constant 0 : i32
    %0 = arith.cmpi eq, %arg0, %c0_i32 : i32
    %1 = arith.extui %0 : i1 to i32
    %c0_i32_0 = arith.constant 0 : i32
    %2 = arith.cmpi ne, %1, %c0_i32_0 : i32
    scf.if %2 {
      %cst_160 = arith.constant 0.000000e+00 : f32
      %635 = vector.broadcast %cst_160 : f32 to vector<2x32xf32>
      %c0_161 = arith.constant 0 : index
      %c0_162 = arith.constant 0 : index
      %636 = vector.load %arg9[%c0_161, %c0_162] : memref<2x32xf32, #tpu.memory_space<vmem>>, vector<2x32xf32>
      tpu.vector_store %arg9[%c0_161, %c0_162], %635 {strides = array<i32>} : memref<2x32xf32, #tpu.memory_space<vmem>>, vector<2x32xf32>,
      %cst_163 = arith.constant 0.000000e+00 : f32
      %637 = vector.broadcast %cst_163 : f32 to vector<2x32xf32>
      %c0_164 = arith.constant 0 : index
      %c0_165 = arith.constant 0 : index
      %638 = vector.load %arg10[%c0_164, %c0_165] : memref<2x32xf32, #tpu.memory_space<vmem>>, vector<2x32xf32>
      tpu.vector_store %arg10[%c0_164, %c0_165], %637 {strides = array<i32>} : memref<2x32xf32, #tpu.memory_space<vmem>>, vector<2x32xf32>,
    } else {
    }
    %c0 = arith.constant 0 : index
    %c0_1 = arith.constant 0 : index
    %3 = vector.load %arg3[%c0, %c0_1] : memref<32x96xbf16, #tpu.memory_space<vmem>>, vector<32x96xbf16>
    %c0_2 = arith.constant 0 : index
    %c0_3 = arith.constant 0 : index
    %4 = vector.load %arg4[%c0_2, %c0_3] : memref<32x96xbf16, #tpu.memory_space<vmem>>, vector<32x96xbf16>
    %c0_4 = arith.constant 0 : index
    %c0_5 = arith.constant 0 : index
    %5 = vector.load %arg5[%c0_4, %c0_5] : memref<1x96xf32, #tpu.memory_space<vmem>>, vector<1x96xf32>
    %c0_6 = arith.constant 0 : index
    %c0_7 = arith.constant 0 : index
    %6 = vector.load %arg6[%c0_6, %c0_7] : memref<1x96xf32, #tpu.memory_space<vmem>>, vector<1x96xf32>
    %c0_8 = arith.constant 0 : index
    %c0_9 = arith.constant 0 : index
    %7 = vector.load %arg9[%c0_8, %c0_9] : memref<2x32xf32, #tpu.memory_space<vmem>>, vector<2x32xf32>
    %c0_10 = arith.constant 0 : index
    %c0_11 = arith.constant 0 : index
    %8 = vector.load %arg10[%c0_10, %c0_11] : memref<2x32xf32, #tpu.memory_space<vmem>>, vector<2x32xf32>
    %c0_i32_12 = arith.constant 0 : i32
    %9 = arith.index_cast %c0_i32_12 : i32 to index
    %c0_13 = arith.constant 0 : index
    %c0_14 = arith.constant 0 : index
    %10 = vector.load %arg1[%9, %c0_13, %c0_14] : memref<8x2x96xbf16, #tpu.memory_space<vmem>>, vector<1x2x96xbf16>
    %11 = vector.shape_cast %10 : vector<1x2x96xbf16> to vector<2x96xbf16>
    %12 = arith.extf %11 : vector<2x96xbf16> to vector<2x96xf32>
    %c7_i32 = arith.constant 7 : i32
    %13 = arith.subi %c7_i32, %c0_i32_12 : i32
    %14 = arith.index_cast %13 : i32 to index
    %c0_15 = arith.constant 0 : index
    %c0_16 = arith.constant 0 : index
    %15 = vector.load %arg2[%14, %c0_15, %c0_16] : memref<8x2x96xbf16, #tpu.memory_space<vmem>>, vector<1x2x96xbf16>
    %16 = vector.shape_cast %15 : vector<1x2x96xbf16> to vector<2x96xbf16>
    %17 = arith.extf %16 : vector<2x96xbf16> to vector<2x96xf32>
    %18 = arith.truncf %7 : vector<2x32xf32> to vector<2x32xbf16>
    %cst = arith.constant dense<0.000000e+00> : vector<2x96xf32>
    %19 = tpu.matmul %18, %3, %cst {dimension_numbers = #tpu.dot_dimension_numbers<[1], [0], [0], [1], [0, 0, 1, 1], [], []>} : vector<2x32xbf16>, vector<32x96xbf16>, vector<2x96xf32> -> vector<2x96xf32>
    %20 = vector.broadcast %5 : vector<1x96xf32> to vector<2x96xf32>
    %21 = arith.addf %19, %20 : vector<2x96xf32>
    %22 = arith.truncf %8 : vector<2x32xf32> to vector<2x32xbf16>
    %cst_17 = arith.constant dense<0.000000e+00> : vector<2x96xf32>
    %23 = tpu.matmul %22, %4, %cst_17 {dimension_numbers = #tpu.dot_dimension_numbers<[1], [0], [0], [1], [0, 0, 1, 1], [], []>} : vector<2x32xbf16>, vector<32x96xbf16>, vector<2x96xf32> -> vector<2x96xf32>
    %24 = vector.broadcast %6 : vector<1x96xf32> to vector<2x96xf32>
    %25 = arith.addf %23, %24 : vector<2x96xf32>
    %26 = vector.extract_strided_slice %12 {offsets = [0, 0], sizes = [2, 32], strides = [1, 1]} : vector<2x96xf32> to vector<2x32xf32>
    %27 = vector.extract_strided_slice %21 {offsets = [0, 0], sizes = [2, 32], strides = [1, 1]} : vector<2x96xf32> to vector<2x32xf32>
    %28 = arith.addf %26, %27 : vector<2x32xf32>
    %29 = arith.negf %28 : vector<2x32xf32>
    %30 = math.exp %29 : vector<2x32xf32>
    %cst_18 = arith.constant 1.000000e+00 : f32
    %31 = vector.broadcast %cst_18 : f32 to vector<2x32xf32>
    %32 = arith.addf %31, %30 : vector<2x32xf32>
    %33 = arith.divf %31, %32 : vector<2x32xf32>
    %34 = vector.extract_strided_slice %12 {offsets = [0, 32], sizes = [2, 32], strides = [1, 1]} : vector<2x96xf32> to vector<2x32xf32>
    %35 = vector.extract_strided_slice %21 {offsets = [0, 32], sizes = [2, 32], strides = [1, 1]} : vector<2x96xf32> to vector<2x32xf32>
    %36 = arith.addf %34, %35 : vector<2x32xf32>
    %37 = arith.negf %36 : vector<2x32xf32>
    %38 = math.exp %37 : vector<2x32xf32>
    %cst_19 = arith.constant 1.000000e+00 : f32
    %39 = vector.broadcast %cst_19 : f32 to vector<2x32xf32>
    %40 = arith.addf %39, %38 : vector<2x32xf32>
    %41 = arith.divf %39, %40 : vector<2x32xf32>
    %42 = vector.extract_strided_slice %12 {offsets = [0, 64], sizes = [2, 32], strides = [1, 1]} : vector<2x96xf32> to vector<2x32xf32>
    %43 = vector.extract_strided_slice %21 {offsets = [0, 64], sizes = [2, 32], strides = [1, 1]} : vector<2x96xf32> to vector<2x32xf32>
    %44 = arith.mulf %33, %43 : vector<2x32xf32>
    %45 = arith.addf %42, %44 : vector<2x32xf32>
    %46 = math.tanh %45 : vector<2x32xf32>
    %cst_20 = arith.constant 1.000000e+00 : f32
    %47 = vector.broadcast %cst_20 : f32 to vector<2x32xf32>
    %48 = arith.subf %47, %41 : vector<2x32xf32>
    %49 = arith.mulf %48, %46 : vector<2x32xf32>
    %50 = arith.mulf %41, %7 : vector<2x32xf32>
    %51 = arith.addf %49, %50 : vector<2x32xf32>
    %52 = vector.extract_strided_slice %17 {offsets = [0, 0], sizes = [2, 32], strides = [1, 1]} : vector<2x96xf32> to vector<2x32xf32>
    %53 = vector.extract_strided_slice %25 {offsets = [0, 0], sizes = [2, 32], strides = [1, 1]} : vector<2x96xf32> to vector<2x32xf32>
    %54 = arith.addf %52, %53 : vector<2x32xf32>
    %55 = arith.negf %54 : vector<2x32xf32>
    %56 = math.exp %55 : vector<2x32xf32>
    %cst_21 = arith.constant 1.000000e+00 : f32
    %57 = vector.broadcast %cst_21 : f32 to vector<2x32xf32>
    %58 = arith.addf %57, %56 : vector<2x32xf32>
    %59 = arith.divf %57, %58 : vector<2x32xf32>
    %60 = vector.extract_strided_slice %17 {offsets = [0, 32], sizes = [2, 32], strides = [1, 1]} : vector<2x96xf32> to vector<2x32xf32>
    %61 = vector.extract_strided_slice %25 {offsets = [0, 32], sizes = [2, 32], strides = [1, 1]} : vector<2x96xf32> to vector<2x32xf32>
    %62 = arith.addf %60, %61 : vector<2x32xf32>
    %63 = arith.negf %62 : vector<2x32xf32>
    %64 = math.exp %63 : vector<2x32xf32>
    %cst_22 = arith.constant 1.000000e+00 : f32
    %65 = vector.broadcast %cst_22 : f32 to vector<2x32xf32>
    %66 = arith.addf %65, %64 : vector<2x32xf32>
    %67 = arith.divf %65, %66 : vector<2x32xf32>
    %68 = vector.extract_strided_slice %17 {offsets = [0, 64], sizes = [2, 32], strides = [1, 1]} : vector<2x96xf32> to vector<2x32xf32>
    %69 = vector.extract_strided_slice %25 {offsets = [0, 64], sizes = [2, 32], strides = [1, 1]} : vector<2x96xf32> to vector<2x32xf32>
    %70 = arith.mulf %59, %69 : vector<2x32xf32>
    %71 = arith.addf %68, %70 : vector<2x32xf32>
    %72 = math.tanh %71 : vector<2x32xf32>
    %cst_23 = arith.constant 1.000000e+00 : f32
    %73 = vector.broadcast %cst_23 : f32 to vector<2x32xf32>
    %74 = arith.subf %73, %67 : vector<2x32xf32>
    %75 = arith.mulf %74, %72 : vector<2x32xf32>
    %76 = arith.mulf %67, %8 : vector<2x32xf32>
    %77 = arith.addf %75, %76 : vector<2x32xf32>
    %78 = arith.index_cast %c0_i32_12 : i32 to index
    %c0_24 = arith.constant 0 : index
    %c0_25 = arith.constant 0 : index
    %79 = vector.load %arg7[%78, %c0_24, %c0_25] : memref<8x2x32xf32, #tpu.memory_space<vmem>>, vector<1x2x32xf32>
    %80 = vector.shape_cast %79 : vector<1x2x32xf32> to vector<2x32xf32>
    %81 = vector.shape_cast %51 : vector<2x32xf32> to vector<1x2x32xf32>
    tpu.vector_store %arg7[%78, %c0_24, %c0_25], %81 {strides = array<i32>} : memref<8x2x32xf32, #tpu.memory_space<vmem>>, vector<1x2x32xf32>,
    %c7_i32_26 = arith.constant 7 : i32
    %82 = arith.subi %c7_i32_26, %c0_i32_12 : i32
    %83 = arith.index_cast %82 : i32 to index
    %c0_27 = arith.constant 0 : index
    %c0_28 = arith.constant 0 : index
    %84 = vector.load %arg8[%83, %c0_27, %c0_28] : memref<8x2x32xf32, #tpu.memory_space<vmem>>, vector<1x2x32xf32>
    %85 = vector.shape_cast %84 : vector<1x2x32xf32> to vector<2x32xf32>
    %86 = vector.shape_cast %77 : vector<2x32xf32> to vector<1x2x32xf32>
    tpu.vector_store %arg8[%83, %c0_27, %c0_28], %86 {strides = array<i32>} : memref<8x2x32xf32, #tpu.memory_space<vmem>>, vector<1x2x32xf32>,
    %c1_i32 = arith.constant 1 : i32
    %87 = arith.index_cast %c1_i32 : i32 to index
    %c0_29 = arith.constant 0 : index
    %c0_30 = arith.constant 0 : index
    %88 = vector.load %arg1[%87, %c0_29, %c0_30] : memref<8x2x96xbf16, #tpu.memory_space<vmem>>, vector<1x2x96xbf16>
    %89 = vector.shape_cast %88 : vector<1x2x96xbf16> to vector<2x96xbf16>
    %90 = arith.extf %89 : vector<2x96xbf16> to vector<2x96xf32>
    %c7_i32_31 = arith.constant 7 : i32
    %91 = arith.subi %c7_i32_31, %c1_i32 : i32
    %92 = arith.index_cast %91 : i32 to index
    %c0_32 = arith.constant 0 : index
    %c0_33 = arith.constant 0 : index
    %93 = vector.load %arg2[%92, %c0_32, %c0_33] : memref<8x2x96xbf16, #tpu.memory_space<vmem>>, vector<1x2x96xbf16>
    %94 = vector.shape_cast %93 : vector<1x2x96xbf16> to vector<2x96xbf16>
    %95 = arith.extf %94 : vector<2x96xbf16> to vector<2x96xf32>
    %96 = arith.truncf %51 : vector<2x32xf32> to vector<2x32xbf16>
    %cst_34 = arith.constant dense<0.000000e+00> : vector<2x96xf32>
    %97 = tpu.matmul %96, %3, %cst_34 {dimension_numbers = #tpu.dot_dimension_numbers<[1], [0], [0], [1], [0, 0, 1, 1], [], []>} : vector<2x32xbf16>, vector<32x96xbf16>, vector<2x96xf32> -> vector<2x96xf32>
    %98 = vector.broadcast %5 : vector<1x96xf32> to vector<2x96xf32>
    %99 = arith.addf %97, %98 : vector<2x96xf32>
    %100 = arith.truncf %77 : vector<2x32xf32> to vector<2x32xbf16>
    %cst_35 = arith.constant dense<0.000000e+00> : vector<2x96xf32>
    %101 = tpu.matmul %100, %4, %cst_35 {dimension_numbers = #tpu.dot_dimension_numbers<[1], [0], [0], [1], [0, 0, 1, 1], [], []>} : vector<2x32xbf16>, vector<32x96xbf16>, vector<2x96xf32> -> vector<2x96xf32>
    %102 = vector.broadcast %6 : vector<1x96xf32> to vector<2x96xf32>
    %103 = arith.addf %101, %102 : vector<2x96xf32>
    %104 = vector.extract_strided_slice %90 {offsets = [0, 0], sizes = [2, 32], strides = [1, 1]} : vector<2x96xf32> to vector<2x32xf32>
    %105 = vector.extract_strided_slice %99 {offsets = [0, 0], sizes = [2, 32], strides = [1, 1]} : vector<2x96xf32> to vector<2x32xf32>
    %106 = arith.addf %104, %105 : vector<2x32xf32>
    %107 = arith.negf %106 : vector<2x32xf32>
    %108 = math.exp %107 : vector<2x32xf32>
    %cst_36 = arith.constant 1.000000e+00 : f32
    %109 = vector.broadcast %cst_36 : f32 to vector<2x32xf32>
    %110 = arith.addf %109, %108 : vector<2x32xf32>
    %111 = arith.divf %109, %110 : vector<2x32xf32>
    %112 = vector.extract_strided_slice %90 {offsets = [0, 32], sizes = [2, 32], strides = [1, 1]} : vector<2x96xf32> to vector<2x32xf32>
    %113 = vector.extract_strided_slice %99 {offsets = [0, 32], sizes = [2, 32], strides = [1, 1]} : vector<2x96xf32> to vector<2x32xf32>
    %114 = arith.addf %112, %113 : vector<2x32xf32>
    %115 = arith.negf %114 : vector<2x32xf32>
    %116 = math.exp %115 : vector<2x32xf32>
    %cst_37 = arith.constant 1.000000e+00 : f32
    %117 = vector.broadcast %cst_37 : f32 to vector<2x32xf32>
    %118 = arith.addf %117, %116 : vector<2x32xf32>
    %119 = arith.divf %117, %118 : vector<2x32xf32>
    %120 = vector.extract_strided_slice %90 {offsets = [0, 64], sizes = [2, 32], strides = [1, 1]} : vector<2x96xf32> to vector<2x32xf32>
    %121 = vector.extract_strided_slice %99 {offsets = [0, 64], sizes = [2, 32], strides = [1, 1]} : vector<2x96xf32> to vector<2x32xf32>
    %122 = arith.mulf %111, %121 : vector<2x32xf32>
    %123 = arith.addf %120, %122 : vector<2x32xf32>
    %124 = math.tanh %123 : vector<2x32xf32>
    %cst_38 = arith.constant 1.000000e+00 : f32
    %125 = vector.broadcast %cst_38 : f32 to vector<2x32xf32>
    %126 = arith.subf %125, %119 : vector<2x32xf32>
    %127 = arith.mulf %126, %124 : vector<2x32xf32>
    %128 = arith.mulf %119, %51 : vector<2x32xf32>
    %129 = arith.addf %127, %128 : vector<2x32xf32>
    %130 = vector.extract_strided_slice %95 {offsets = [0, 0], sizes = [2, 32], strides = [1, 1]} : vector<2x96xf32> to vector<2x32xf32>
    %131 = vector.extract_strided_slice %103 {offsets = [0, 0], sizes = [2, 32], strides = [1, 1]} : vector<2x96xf32> to vector<2x32xf32>
    %132 = arith.addf %130, %131 : vector<2x32xf32>
    %133 = arith.negf %132 : vector<2x32xf32>
    %134 = math.exp %133 : vector<2x32xf32>
    %cst_39 = arith.constant 1.000000e+00 : f32
    %135 = vector.broadcast %cst_39 : f32 to vector<2x32xf32>
    %136 = arith.addf %135, %134 : vector<2x32xf32>
    %137 = arith.divf %135, %136 : vector<2x32xf32>
    %138 = vector.extract_strided_slice %95 {offsets = [0, 32], sizes = [2, 32], strides = [1, 1]} : vector<2x96xf32> to vector<2x32xf32>
    %139 = vector.extract_strided_slice %103 {offsets = [0, 32], sizes = [2, 32], strides = [1, 1]} : vector<2x96xf32> to vector<2x32xf32>
    %140 = arith.addf %138, %139 : vector<2x32xf32>
    %141 = arith.negf %140 : vector<2x32xf32>
    %142 = math.exp %141 : vector<2x32xf32>
    %cst_40 = arith.constant 1.000000e+00 : f32
    %143 = vector.broadcast %cst_40 : f32 to vector<2x32xf32>
    %144 = arith.addf %143, %142 : vector<2x32xf32>
    %145 = arith.divf %143, %144 : vector<2x32xf32>
    %146 = vector.extract_strided_slice %95 {offsets = [0, 64], sizes = [2, 32], strides = [1, 1]} : vector<2x96xf32> to vector<2x32xf32>
    %147 = vector.extract_strided_slice %103 {offsets = [0, 64], sizes = [2, 32], strides = [1, 1]} : vector<2x96xf32> to vector<2x32xf32>
    %148 = arith.mulf %137, %147 : vector<2x32xf32>
    %149 = arith.addf %146, %148 : vector<2x32xf32>
    %150 = math.tanh %149 : vector<2x32xf32>
    %cst_41 = arith.constant 1.000000e+00 : f32
    %151 = vector.broadcast %cst_41 : f32 to vector<2x32xf32>
    %152 = arith.subf %151, %145 : vector<2x32xf32>
    %153 = arith.mulf %152, %150 : vector<2x32xf32>
    %154 = arith.mulf %145, %77 : vector<2x32xf32>
    %155 = arith.addf %153, %154 : vector<2x32xf32>
    %156 = arith.index_cast %c1_i32 : i32 to index
    %c0_42 = arith.constant 0 : index
    %c0_43 = arith.constant 0 : index
    %157 = vector.load %arg7[%156, %c0_42, %c0_43] : memref<8x2x32xf32, #tpu.memory_space<vmem>>, vector<1x2x32xf32>
    %158 = vector.shape_cast %157 : vector<1x2x32xf32> to vector<2x32xf32>
    %159 = vector.shape_cast %129 : vector<2x32xf32> to vector<1x2x32xf32>
    tpu.vector_store %arg7[%156, %c0_42, %c0_43], %159 {strides = array<i32>} : memref<8x2x32xf32, #tpu.memory_space<vmem>>, vector<1x2x32xf32>,
    %c7_i32_44 = arith.constant 7 : i32
    %160 = arith.subi %c7_i32_44, %c1_i32 : i32
    %161 = arith.index_cast %160 : i32 to index
    %c0_45 = arith.constant 0 : index
    %c0_46 = arith.constant 0 : index
    %162 = vector.load %arg8[%161, %c0_45, %c0_46] : memref<8x2x32xf32, #tpu.memory_space<vmem>>, vector<1x2x32xf32>
    %163 = vector.shape_cast %162 : vector<1x2x32xf32> to vector<2x32xf32>
    %164 = vector.shape_cast %155 : vector<2x32xf32> to vector<1x2x32xf32>
    tpu.vector_store %arg8[%161, %c0_45, %c0_46], %164 {strides = array<i32>} : memref<8x2x32xf32, #tpu.memory_space<vmem>>, vector<1x2x32xf32>,
    %c2_i32 = arith.constant 2 : i32
    %165 = arith.index_cast %c2_i32 : i32 to index
    %c0_47 = arith.constant 0 : index
    %c0_48 = arith.constant 0 : index
    %166 = vector.load %arg1[%165, %c0_47, %c0_48] : memref<8x2x96xbf16, #tpu.memory_space<vmem>>, vector<1x2x96xbf16>
    %167 = vector.shape_cast %166 : vector<1x2x96xbf16> to vector<2x96xbf16>
    %168 = arith.extf %167 : vector<2x96xbf16> to vector<2x96xf32>
    %c7_i32_49 = arith.constant 7 : i32
    %169 = arith.subi %c7_i32_49, %c2_i32 : i32
    %170 = arith.index_cast %169 : i32 to index
    %c0_50 = arith.constant 0 : index
    %c0_51 = arith.constant 0 : index
    %171 = vector.load %arg2[%170, %c0_50, %c0_51] : memref<8x2x96xbf16, #tpu.memory_space<vmem>>, vector<1x2x96xbf16>
    %172 = vector.shape_cast %171 : vector<1x2x96xbf16> to vector<2x96xbf16>
    %173 = arith.extf %172 : vector<2x96xbf16> to vector<2x96xf32>
    %174 = arith.truncf %129 : vector<2x32xf32> to vector<2x32xbf16>
    %cst_52 = arith.constant dense<0.000000e+00> : vector<2x96xf32>
    %175 = tpu.matmul %174, %3, %cst_52 {dimension_numbers = #tpu.dot_dimension_numbers<[1], [0], [0], [1], [0, 0, 1, 1], [], []>} : vector<2x32xbf16>, vector<32x96xbf16>, vector<2x96xf32> -> vector<2x96xf32>
    %176 = vector.broadcast %5 : vector<1x96xf32> to vector<2x96xf32>
    %177 = arith.addf %175, %176 : vector<2x96xf32>
    %178 = arith.truncf %155 : vector<2x32xf32> to vector<2x32xbf16>
    %cst_53 = arith.constant dense<0.000000e+00> : vector<2x96xf32>
    %179 = tpu.matmul %178, %4, %cst_53 {dimension_numbers = #tpu.dot_dimension_numbers<[1], [0], [0], [1], [0, 0, 1, 1], [], []>} : vector<2x32xbf16>, vector<32x96xbf16>, vector<2x96xf32> -> vector<2x96xf32>
    %180 = vector.broadcast %6 : vector<1x96xf32> to vector<2x96xf32>
    %181 = arith.addf %179, %180 : vector<2x96xf32>
    %182 = vector.extract_strided_slice %168 {offsets = [0, 0], sizes = [2, 32], strides = [1, 1]} : vector<2x96xf32> to vector<2x32xf32>
    %183 = vector.extract_strided_slice %177 {offsets = [0, 0], sizes = [2, 32], strides = [1, 1]} : vector<2x96xf32> to vector<2x32xf32>
    %184 = arith.addf %182, %183 : vector<2x32xf32>
    %185 = arith.negf %184 : vector<2x32xf32>
    %186 = math.exp %185 : vector<2x32xf32>
    %cst_54 = arith.constant 1.000000e+00 : f32
    %187 = vector.broadcast %cst_54 : f32 to vector<2x32xf32>
    %188 = arith.addf %187, %186 : vector<2x32xf32>
    %189 = arith.divf %187, %188 : vector<2x32xf32>
    %190 = vector.extract_strided_slice %168 {offsets = [0, 32], sizes = [2, 32], strides = [1, 1]} : vector<2x96xf32> to vector<2x32xf32>
    %191 = vector.extract_strided_slice %177 {offsets = [0, 32], sizes = [2, 32], strides = [1, 1]} : vector<2x96xf32> to vector<2x32xf32>
    %192 = arith.addf %190, %191 : vector<2x32xf32>
    %193 = arith.negf %192 : vector<2x32xf32>
    %194 = math.exp %193 : vector<2x32xf32>
    %cst_55 = arith.constant 1.000000e+00 : f32
    %195 = vector.broadcast %cst_55 : f32 to vector<2x32xf32>
    %196 = arith.addf %195, %194 : vector<2x32xf32>
    %197 = arith.divf %195, %196 : vector<2x32xf32>
    %198 = vector.extract_strided_slice %168 {offsets = [0, 64], sizes = [2, 32], strides = [1, 1]} : vector<2x96xf32> to vector<2x32xf32>
    %199 = vector.extract_strided_slice %177 {offsets = [0, 64], sizes = [2, 32], strides = [1, 1]} : vector<2x96xf32> to vector<2x32xf32>
    %200 = arith.mulf %189, %199 : vector<2x32xf32>
    %201 = arith.addf %198, %200 : vector<2x32xf32>
    %202 = math.tanh %201 : vector<2x32xf32>
    %cst_56 = arith.constant 1.000000e+00 : f32
    %203 = vector.broadcast %cst_56 : f32 to vector<2x32xf32>
    %204 = arith.subf %203, %197 : vector<2x32xf32>
    %205 = arith.mulf %204, %202 : vector<2x32xf32>
    %206 = arith.mulf %197, %129 : vector<2x32xf32>
    %207 = arith.addf %205, %206 : vector<2x32xf32>
    %208 = vector.extract_strided_slice %173 {offsets = [0, 0], sizes = [2, 32], strides = [1, 1]} : vector<2x96xf32> to vector<2x32xf32>
    %209 = vector.extract_strided_slice %181 {offsets = [0, 0], sizes = [2, 32], strides = [1, 1]} : vector<2x96xf32> to vector<2x32xf32>
    %210 = arith.addf %208, %209 : vector<2x32xf32>
    %211 = arith.negf %210 : vector<2x32xf32>
    %212 = math.exp %211 : vector<2x32xf32>
    %cst_57 = arith.constant 1.000000e+00 : f32
    %213 = vector.broadcast %cst_57 : f32 to vector<2x32xf32>
    %214 = arith.addf %213, %212 : vector<2x32xf32>
    %215 = arith.divf %213, %214 : vector<2x32xf32>
    %216 = vector.extract_strided_slice %173 {offsets = [0, 32], sizes = [2, 32], strides = [1, 1]} : vector<2x96xf32> to vector<2x32xf32>
    %217 = vector.extract_strided_slice %181 {offsets = [0, 32], sizes = [2, 32], strides = [1, 1]} : vector<2x96xf32> to vector<2x32xf32>
    %218 = arith.addf %216, %217 : vector<2x32xf32>
    %219 = arith.negf %218 : vector<2x32xf32>
    %220 = math.exp %219 : vector<2x32xf32>
    %cst_58 = arith.constant 1.000000e+00 : f32
    %221 = vector.broadcast %cst_58 : f32 to vector<2x32xf32>
    %222 = arith.addf %221, %220 : vector<2x32xf32>
    %223 = arith.divf %221, %222 : vector<2x32xf32>
    %224 = vector.extract_strided_slice %173 {offsets = [0, 64], sizes = [2, 32], strides = [1, 1]} : vector<2x96xf32> to vector<2x32xf32>
    %225 = vector.extract_strided_slice %181 {offsets = [0, 64], sizes = [2, 32], strides = [1, 1]} : vector<2x96xf32> to vector<2x32xf32>
    %226 = arith.mulf %215, %225 : vector<2x32xf32>
    %227 = arith.addf %224, %226 : vector<2x32xf32>
    %228 = math.tanh %227 : vector<2x32xf32>
    %cst_59 = arith.constant 1.000000e+00 : f32
    %229 = vector.broadcast %cst_59 : f32 to vector<2x32xf32>
    %230 = arith.subf %229, %223 : vector<2x32xf32>
    %231 = arith.mulf %230, %228 : vector<2x32xf32>
    %232 = arith.mulf %223, %155 : vector<2x32xf32>
    %233 = arith.addf %231, %232 : vector<2x32xf32>
    %234 = arith.index_cast %c2_i32 : i32 to index
    %c0_60 = arith.constant 0 : index
    %c0_61 = arith.constant 0 : index
    %235 = vector.load %arg7[%234, %c0_60, %c0_61] : memref<8x2x32xf32, #tpu.memory_space<vmem>>, vector<1x2x32xf32>
    %236 = vector.shape_cast %235 : vector<1x2x32xf32> to vector<2x32xf32>
    %237 = vector.shape_cast %207 : vector<2x32xf32> to vector<1x2x32xf32>
    tpu.vector_store %arg7[%234, %c0_60, %c0_61], %237 {strides = array<i32>} : memref<8x2x32xf32, #tpu.memory_space<vmem>>, vector<1x2x32xf32>,
    %c7_i32_62 = arith.constant 7 : i32
    %238 = arith.subi %c7_i32_62, %c2_i32 : i32
    %239 = arith.index_cast %238 : i32 to index
    %c0_63 = arith.constant 0 : index
    %c0_64 = arith.constant 0 : index
    %240 = vector.load %arg8[%239, %c0_63, %c0_64] : memref<8x2x32xf32, #tpu.memory_space<vmem>>, vector<1x2x32xf32>
    %241 = vector.shape_cast %240 : vector<1x2x32xf32> to vector<2x32xf32>
    %242 = vector.shape_cast %233 : vector<2x32xf32> to vector<1x2x32xf32>
    tpu.vector_store %arg8[%239, %c0_63, %c0_64], %242 {strides = array<i32>} : memref<8x2x32xf32, #tpu.memory_space<vmem>>, vector<1x2x32xf32>,
    %c3_i32 = arith.constant 3 : i32
    %243 = arith.index_cast %c3_i32 : i32 to index
    %c0_65 = arith.constant 0 : index
    %c0_66 = arith.constant 0 : index
    %244 = vector.load %arg1[%243, %c0_65, %c0_66] : memref<8x2x96xbf16, #tpu.memory_space<vmem>>, vector<1x2x96xbf16>
    %245 = vector.shape_cast %244 : vector<1x2x96xbf16> to vector<2x96xbf16>
    %246 = arith.extf %245 : vector<2x96xbf16> to vector<2x96xf32>
    %c7_i32_67 = arith.constant 7 : i32
    %247 = arith.subi %c7_i32_67, %c3_i32 : i32
    %248 = arith.index_cast %247 : i32 to index
    %c0_68 = arith.constant 0 : index
    %c0_69 = arith.constant 0 : index
    %249 = vector.load %arg2[%248, %c0_68, %c0_69] : memref<8x2x96xbf16, #tpu.memory_space<vmem>>, vector<1x2x96xbf16>
    %250 = vector.shape_cast %249 : vector<1x2x96xbf16> to vector<2x96xbf16>
    %251 = arith.extf %250 : vector<2x96xbf16> to vector<2x96xf32>
    %252 = arith.truncf %207 : vector<2x32xf32> to vector<2x32xbf16>
    %cst_70 = arith.constant dense<0.000000e+00> : vector<2x96xf32>
    %253 = tpu.matmul %252, %3, %cst_70 {dimension_numbers = #tpu.dot_dimension_numbers<[1], [0], [0], [1], [0, 0, 1, 1], [], []>} : vector<2x32xbf16>, vector<32x96xbf16>, vector<2x96xf32> -> vector<2x96xf32>
    %254 = vector.broadcast %5 : vector<1x96xf32> to vector<2x96xf32>
    %255 = arith.addf %253, %254 : vector<2x96xf32>
    %256 = arith.truncf %233 : vector<2x32xf32> to vector<2x32xbf16>
    %cst_71 = arith.constant dense<0.000000e+00> : vector<2x96xf32>
    %257 = tpu.matmul %256, %4, %cst_71 {dimension_numbers = #tpu.dot_dimension_numbers<[1], [0], [0], [1], [0, 0, 1, 1], [], []>} : vector<2x32xbf16>, vector<32x96xbf16>, vector<2x96xf32> -> vector<2x96xf32>
    %258 = vector.broadcast %6 : vector<1x96xf32> to vector<2x96xf32>
    %259 = arith.addf %257, %258 : vector<2x96xf32>
    %260 = vector.extract_strided_slice %246 {offsets = [0, 0], sizes = [2, 32], strides = [1, 1]} : vector<2x96xf32> to vector<2x32xf32>
    %261 = vector.extract_strided_slice %255 {offsets = [0, 0], sizes = [2, 32], strides = [1, 1]} : vector<2x96xf32> to vector<2x32xf32>
    %262 = arith.addf %260, %261 : vector<2x32xf32>
    %263 = arith.negf %262 : vector<2x32xf32>
    %264 = math.exp %263 : vector<2x32xf32>
    %cst_72 = arith.constant 1.000000e+00 : f32
    %265 = vector.broadcast %cst_72 : f32 to vector<2x32xf32>
    %266 = arith.addf %265, %264 : vector<2x32xf32>
    %267 = arith.divf %265, %266 : vector<2x32xf32>
    %268 = vector.extract_strided_slice %246 {offsets = [0, 32], sizes = [2, 32], strides = [1, 1]} : vector<2x96xf32> to vector<2x32xf32>
    %269 = vector.extract_strided_slice %255 {offsets = [0, 32], sizes = [2, 32], strides = [1, 1]} : vector<2x96xf32> to vector<2x32xf32>
    %270 = arith.addf %268, %269 : vector<2x32xf32>
    %271 = arith.negf %270 : vector<2x32xf32>
    %272 = math.exp %271 : vector<2x32xf32>
    %cst_73 = arith.constant 1.000000e+00 : f32
    %273 = vector.broadcast %cst_73 : f32 to vector<2x32xf32>
    %274 = arith.addf %273, %272 : vector<2x32xf32>
    %275 = arith.divf %273, %274 : vector<2x32xf32>
    %276 = vector.extract_strided_slice %246 {offsets = [0, 64], sizes = [2, 32], strides = [1, 1]} : vector<2x96xf32> to vector<2x32xf32>
    %277 = vector.extract_strided_slice %255 {offsets = [0, 64], sizes = [2, 32], strides = [1, 1]} : vector<2x96xf32> to vector<2x32xf32>
    %278 = arith.mulf %267, %277 : vector<2x32xf32>
    %279 = arith.addf %276, %278 : vector<2x32xf32>
    %280 = math.tanh %279 : vector<2x32xf32>
    %cst_74 = arith.constant 1.000000e+00 : f32
    %281 = vector.broadcast %cst_74 : f32 to vector<2x32xf32>
    %282 = arith.subf %281, %275 : vector<2x32xf32>
    %283 = arith.mulf %282, %280 : vector<2x32xf32>
    %284 = arith.mulf %275, %207 : vector<2x32xf32>
    %285 = arith.addf %283, %284 : vector<2x32xf32>
    %286 = vector.extract_strided_slice %251 {offsets = [0, 0], sizes = [2, 32], strides = [1, 1]} : vector<2x96xf32> to vector<2x32xf32>
    %287 = vector.extract_strided_slice %259 {offsets = [0, 0], sizes = [2, 32], strides = [1, 1]} : vector<2x96xf32> to vector<2x32xf32>
    %288 = arith.addf %286, %287 : vector<2x32xf32>
    %289 = arith.negf %288 : vector<2x32xf32>
    %290 = math.exp %289 : vector<2x32xf32>
    %cst_75 = arith.constant 1.000000e+00 : f32
    %291 = vector.broadcast %cst_75 : f32 to vector<2x32xf32>
    %292 = arith.addf %291, %290 : vector<2x32xf32>
    %293 = arith.divf %291, %292 : vector<2x32xf32>
    %294 = vector.extract_strided_slice %251 {offsets = [0, 32], sizes = [2, 32], strides = [1, 1]} : vector<2x96xf32> to vector<2x32xf32>
    %295 = vector.extract_strided_slice %259 {offsets = [0, 32], sizes = [2, 32], strides = [1, 1]} : vector<2x96xf32> to vector<2x32xf32>
    %296 = arith.addf %294, %295 : vector<2x32xf32>
    %297 = arith.negf %296 : vector<2x32xf32>
    %298 = math.exp %297 : vector<2x32xf32>
    %cst_76 = arith.constant 1.000000e+00 : f32
    %299 = vector.broadcast %cst_76 : f32 to vector<2x32xf32>
    %300 = arith.addf %299, %298 : vector<2x32xf32>
    %301 = arith.divf %299, %300 : vector<2x32xf32>
    %302 = vector.extract_strided_slice %251 {offsets = [0, 64], sizes = [2, 32], strides = [1, 1]} : vector<2x96xf32> to vector<2x32xf32>
    %303 = vector.extract_strided_slice %259 {offsets = [0, 64], sizes = [2, 32], strides = [1, 1]} : vector<2x96xf32> to vector<2x32xf32>
    %304 = arith.mulf %293, %303 : vector<2x32xf32>
    %305 = arith.addf %302, %304 : vector<2x32xf32>
    %306 = math.tanh %305 : vector<2x32xf32>
    %cst_77 = arith.constant 1.000000e+00 : f32
    %307 = vector.broadcast %cst_77 : f32 to vector<2x32xf32>
    %308 = arith.subf %307, %301 : vector<2x32xf32>
    %309 = arith.mulf %308, %306 : vector<2x32xf32>
    %310 = arith.mulf %301, %233 : vector<2x32xf32>
    %311 = arith.addf %309, %310 : vector<2x32xf32>
    %312 = arith.index_cast %c3_i32 : i32 to index
    %c0_78 = arith.constant 0 : index
    %c0_79 = arith.constant 0 : index
    %313 = vector.load %arg7[%312, %c0_78, %c0_79] : memref<8x2x32xf32, #tpu.memory_space<vmem>>, vector<1x2x32xf32>
    %314 = vector.shape_cast %313 : vector<1x2x32xf32> to vector<2x32xf32>
    %315 = vector.shape_cast %285 : vector<2x32xf32> to vector<1x2x32xf32>
    tpu.vector_store %arg7[%312, %c0_78, %c0_79], %315 {strides = array<i32>} : memref<8x2x32xf32, #tpu.memory_space<vmem>>, vector<1x2x32xf32>,
    %c7_i32_80 = arith.constant 7 : i32
    %316 = arith.subi %c7_i32_80, %c3_i32 : i32
    %317 = arith.index_cast %316 : i32 to index
    %c0_81 = arith.constant 0 : index
    %c0_82 = arith.constant 0 : index
    %318 = vector.load %arg8[%317, %c0_81, %c0_82] : memref<8x2x32xf32, #tpu.memory_space<vmem>>, vector<1x2x32xf32>
    %319 = vector.shape_cast %318 : vector<1x2x32xf32> to vector<2x32xf32>
    %320 = vector.shape_cast %311 : vector<2x32xf32> to vector<1x2x32xf32>
    tpu.vector_store %arg8[%317, %c0_81, %c0_82], %320 {strides = array<i32>} : memref<8x2x32xf32, #tpu.memory_space<vmem>>, vector<1x2x32xf32>,
    %c4_i32 = arith.constant 4 : i32
    %321 = arith.index_cast %c4_i32 : i32 to index
    %c0_83 = arith.constant 0 : index
    %c0_84 = arith.constant 0 : index
    %322 = vector.load %arg1[%321, %c0_83, %c0_84] : memref<8x2x96xbf16, #tpu.memory_space<vmem>>, vector<1x2x96xbf16>
    %323 = vector.shape_cast %322 : vector<1x2x96xbf16> to vector<2x96xbf16>
    %324 = arith.extf %323 : vector<2x96xbf16> to vector<2x96xf32>
    %c7_i32_85 = arith.constant 7 : i32
    %325 = arith.subi %c7_i32_85, %c4_i32 : i32
    %326 = arith.index_cast %325 : i32 to index
    %c0_86 = arith.constant 0 : index
    %c0_87 = arith.constant 0 : index
    %327 = vector.load %arg2[%326, %c0_86, %c0_87] : memref<8x2x96xbf16, #tpu.memory_space<vmem>>, vector<1x2x96xbf16>
    %328 = vector.shape_cast %327 : vector<1x2x96xbf16> to vector<2x96xbf16>
    %329 = arith.extf %328 : vector<2x96xbf16> to vector<2x96xf32>
    %330 = arith.truncf %285 : vector<2x32xf32> to vector<2x32xbf16>
    %cst_88 = arith.constant dense<0.000000e+00> : vector<2x96xf32>
    %331 = tpu.matmul %330, %3, %cst_88 {dimension_numbers = #tpu.dot_dimension_numbers<[1], [0], [0], [1], [0, 0, 1, 1], [], []>} : vector<2x32xbf16>, vector<32x96xbf16>, vector<2x96xf32> -> vector<2x96xf32>
    %332 = vector.broadcast %5 : vector<1x96xf32> to vector<2x96xf32>
    %333 = arith.addf %331, %332 : vector<2x96xf32>
    %334 = arith.truncf %311 : vector<2x32xf32> to vector<2x32xbf16>
    %cst_89 = arith.constant dense<0.000000e+00> : vector<2x96xf32>
    %335 = tpu.matmul %334, %4, %cst_89 {dimension_numbers = #tpu.dot_dimension_numbers<[1], [0], [0], [1], [0, 0, 1, 1], [], []>} : vector<2x32xbf16>, vector<32x96xbf16>, vector<2x96xf32> -> vector<2x96xf32>
    %336 = vector.broadcast %6 : vector<1x96xf32> to vector<2x96xf32>
    %337 = arith.addf %335, %336 : vector<2x96xf32>
    %338 = vector.extract_strided_slice %324 {offsets = [0, 0], sizes = [2, 32], strides = [1, 1]} : vector<2x96xf32> to vector<2x32xf32>
    %339 = vector.extract_strided_slice %333 {offsets = [0, 0], sizes = [2, 32], strides = [1, 1]} : vector<2x96xf32> to vector<2x32xf32>
    %340 = arith.addf %338, %339 : vector<2x32xf32>
    %341 = arith.negf %340 : vector<2x32xf32>
    %342 = math.exp %341 : vector<2x32xf32>
    %cst_90 = arith.constant 1.000000e+00 : f32
    %343 = vector.broadcast %cst_90 : f32 to vector<2x32xf32>
    %344 = arith.addf %343, %342 : vector<2x32xf32>
    %345 = arith.divf %343, %344 : vector<2x32xf32>
    %346 = vector.extract_strided_slice %324 {offsets = [0, 32], sizes = [2, 32], strides = [1, 1]} : vector<2x96xf32> to vector<2x32xf32>
    %347 = vector.extract_strided_slice %333 {offsets = [0, 32], sizes = [2, 32], strides = [1, 1]} : vector<2x96xf32> to vector<2x32xf32>
    %348 = arith.addf %346, %347 : vector<2x32xf32>
    %349 = arith.negf %348 : vector<2x32xf32>
    %350 = math.exp %349 : vector<2x32xf32>
    %cst_91 = arith.constant 1.000000e+00 : f32
    %351 = vector.broadcast %cst_91 : f32 to vector<2x32xf32>
    %352 = arith.addf %351, %350 : vector<2x32xf32>
    %353 = arith.divf %351, %352 : vector<2x32xf32>
    %354 = vector.extract_strided_slice %324 {offsets = [0, 64], sizes = [2, 32], strides = [1, 1]} : vector<2x96xf32> to vector<2x32xf32>
    %355 = vector.extract_strided_slice %333 {offsets = [0, 64], sizes = [2, 32], strides = [1, 1]} : vector<2x96xf32> to vector<2x32xf32>
    %356 = arith.mulf %345, %355 : vector<2x32xf32>
    %357 = arith.addf %354, %356 : vector<2x32xf32>
    %358 = math.tanh %357 : vector<2x32xf32>
    %cst_92 = arith.constant 1.000000e+00 : f32
    %359 = vector.broadcast %cst_92 : f32 to vector<2x32xf32>
    %360 = arith.subf %359, %353 : vector<2x32xf32>
    %361 = arith.mulf %360, %358 : vector<2x32xf32>
    %362 = arith.mulf %353, %285 : vector<2x32xf32>
    %363 = arith.addf %361, %362 : vector<2x32xf32>
    %364 = vector.extract_strided_slice %329 {offsets = [0, 0], sizes = [2, 32], strides = [1, 1]} : vector<2x96xf32> to vector<2x32xf32>
    %365 = vector.extract_strided_slice %337 {offsets = [0, 0], sizes = [2, 32], strides = [1, 1]} : vector<2x96xf32> to vector<2x32xf32>
    %366 = arith.addf %364, %365 : vector<2x32xf32>
    %367 = arith.negf %366 : vector<2x32xf32>
    %368 = math.exp %367 : vector<2x32xf32>
    %cst_93 = arith.constant 1.000000e+00 : f32
    %369 = vector.broadcast %cst_93 : f32 to vector<2x32xf32>
    %370 = arith.addf %369, %368 : vector<2x32xf32>
    %371 = arith.divf %369, %370 : vector<2x32xf32>
    %372 = vector.extract_strided_slice %329 {offsets = [0, 32], sizes = [2, 32], strides = [1, 1]} : vector<2x96xf32> to vector<2x32xf32>
    %373 = vector.extract_strided_slice %337 {offsets = [0, 32], sizes = [2, 32], strides = [1, 1]} : vector<2x96xf32> to vector<2x32xf32>
    %374 = arith.addf %372, %373 : vector<2x32xf32>
    %375 = arith.negf %374 : vector<2x32xf32>
    %376 = math.exp %375 : vector<2x32xf32>
    %cst_94 = arith.constant 1.000000e+00 : f32
    %377 = vector.broadcast %cst_94 : f32 to vector<2x32xf32>
    %378 = arith.addf %377, %376 : vector<2x32xf32>
    %379 = arith.divf %377, %378 : vector<2x32xf32>
    %380 = vector.extract_strided_slice %329 {offsets = [0, 64], sizes = [2, 32], strides = [1, 1]} : vector<2x96xf32> to vector<2x32xf32>
    %381 = vector.extract_strided_slice %337 {offsets = [0, 64], sizes = [2, 32], strides = [1, 1]} : vector<2x96xf32> to vector<2x32xf32>
    %382 = arith.mulf %371, %381 : vector<2x32xf32>
    %383 = arith.addf %380, %382 : vector<2x32xf32>
    %384 = math.tanh %383 : vector<2x32xf32>
    %cst_95 = arith.constant 1.000000e+00 : f32
    %385 = vector.broadcast %cst_95 : f32 to vector<2x32xf32>
    %386 = arith.subf %385, %379 : vector<2x32xf32>
    %387 = arith.mulf %386, %384 : vector<2x32xf32>
    %388 = arith.mulf %379, %311 : vector<2x32xf32>
    %389 = arith.addf %387, %388 : vector<2x32xf32>
    %390 = arith.index_cast %c4_i32 : i32 to index
    %c0_96 = arith.constant 0 : index
    %c0_97 = arith.constant 0 : index
    %391 = vector.load %arg7[%390, %c0_96, %c0_97] : memref<8x2x32xf32, #tpu.memory_space<vmem>>, vector<1x2x32xf32>
    %392 = vector.shape_cast %391 : vector<1x2x32xf32> to vector<2x32xf32>
    %393 = vector.shape_cast %363 : vector<2x32xf32> to vector<1x2x32xf32>
    tpu.vector_store %arg7[%390, %c0_96, %c0_97], %393 {strides = array<i32>} : memref<8x2x32xf32, #tpu.memory_space<vmem>>, vector<1x2x32xf32>,
    %c7_i32_98 = arith.constant 7 : i32
    %394 = arith.subi %c7_i32_98, %c4_i32 : i32
    %395 = arith.index_cast %394 : i32 to index
    %c0_99 = arith.constant 0 : index
    %c0_100 = arith.constant 0 : index
    %396 = vector.load %arg8[%395, %c0_99, %c0_100] : memref<8x2x32xf32, #tpu.memory_space<vmem>>, vector<1x2x32xf32>
    %397 = vector.shape_cast %396 : vector<1x2x32xf32> to vector<2x32xf32>
    %398 = vector.shape_cast %389 : vector<2x32xf32> to vector<1x2x32xf32>
    tpu.vector_store %arg8[%395, %c0_99, %c0_100], %398 {strides = array<i32>} : memref<8x2x32xf32, #tpu.memory_space<vmem>>, vector<1x2x32xf32>,
    %c5_i32 = arith.constant 5 : i32
    %399 = arith.index_cast %c5_i32 : i32 to index
    %c0_101 = arith.constant 0 : index
    %c0_102 = arith.constant 0 : index
    %400 = vector.load %arg1[%399, %c0_101, %c0_102] : memref<8x2x96xbf16, #tpu.memory_space<vmem>>, vector<1x2x96xbf16>
    %401 = vector.shape_cast %400 : vector<1x2x96xbf16> to vector<2x96xbf16>
    %402 = arith.extf %401 : vector<2x96xbf16> to vector<2x96xf32>
    %c7_i32_103 = arith.constant 7 : i32
    %403 = arith.subi %c7_i32_103, %c5_i32 : i32
    %404 = arith.index_cast %403 : i32 to index
    %c0_104 = arith.constant 0 : index
    %c0_105 = arith.constant 0 : index
    %405 = vector.load %arg2[%404, %c0_104, %c0_105] : memref<8x2x96xbf16, #tpu.memory_space<vmem>>, vector<1x2x96xbf16>
    %406 = vector.shape_cast %405 : vector<1x2x96xbf16> to vector<2x96xbf16>
    %407 = arith.extf %406 : vector<2x96xbf16> to vector<2x96xf32>
    %408 = arith.truncf %363 : vector<2x32xf32> to vector<2x32xbf16>
    %cst_106 = arith.constant dense<0.000000e+00> : vector<2x96xf32>
    %409 = tpu.matmul %408, %3, %cst_106 {dimension_numbers = #tpu.dot_dimension_numbers<[1], [0], [0], [1], [0, 0, 1, 1], [], []>} : vector<2x32xbf16>, vector<32x96xbf16>, vector<2x96xf32> -> vector<2x96xf32>
    %410 = vector.broadcast %5 : vector<1x96xf32> to vector<2x96xf32>
    %411 = arith.addf %409, %410 : vector<2x96xf32>
    %412 = arith.truncf %389 : vector<2x32xf32> to vector<2x32xbf16>
    %cst_107 = arith.constant dense<0.000000e+00> : vector<2x96xf32>
    %413 = tpu.matmul %412, %4, %cst_107 {dimension_numbers = #tpu.dot_dimension_numbers<[1], [0], [0], [1], [0, 0, 1, 1], [], []>} : vector<2x32xbf16>, vector<32x96xbf16>, vector<2x96xf32> -> vector<2x96xf32>
    %414 = vector.broadcast %6 : vector<1x96xf32> to vector<2x96xf32>
    %415 = arith.addf %413, %414 : vector<2x96xf32>
    %416 = vector.extract_strided_slice %402 {offsets = [0, 0], sizes = [2, 32], strides = [1, 1]} : vector<2x96xf32> to vector<2x32xf32>
    %417 = vector.extract_strided_slice %411 {offsets = [0, 0], sizes = [2, 32], strides = [1, 1]} : vector<2x96xf32> to vector<2x32xf32>
    %418 = arith.addf %416, %417 : vector<2x32xf32>
    %419 = arith.negf %418 : vector<2x32xf32>
    %420 = math.exp %419 : vector<2x32xf32>
    %cst_108 = arith.constant 1.000000e+00 : f32
    %421 = vector.broadcast %cst_108 : f32 to vector<2x32xf32>
    %422 = arith.addf %421, %420 : vector<2x32xf32>
    %423 = arith.divf %421, %422 : vector<2x32xf32>
    %424 = vector.extract_strided_slice %402 {offsets = [0, 32], sizes = [2, 32], strides = [1, 1]} : vector<2x96xf32> to vector<2x32xf32>
    %425 = vector.extract_strided_slice %411 {offsets = [0, 32], sizes = [2, 32], strides = [1, 1]} : vector<2x96xf32> to vector<2x32xf32>
    %426 = arith.addf %424, %425 : vector<2x32xf32>
    %427 = arith.negf %426 : vector<2x32xf32>
    %428 = math.exp %427 : vector<2x32xf32>
    %cst_109 = arith.constant 1.000000e+00 : f32
    %429 = vector.broadcast %cst_109 : f32 to vector<2x32xf32>
    %430 = arith.addf %429, %428 : vector<2x32xf32>
    %431 = arith.divf %429, %430 : vector<2x32xf32>
    %432 = vector.extract_strided_slice %402 {offsets = [0, 64], sizes = [2, 32], strides = [1, 1]} : vector<2x96xf32> to vector<2x32xf32>
    %433 = vector.extract_strided_slice %411 {offsets = [0, 64], sizes = [2, 32], strides = [1, 1]} : vector<2x96xf32> to vector<2x32xf32>
    %434 = arith.mulf %423, %433 : vector<2x32xf32>
    %435 = arith.addf %432, %434 : vector<2x32xf32>
    %436 = math.tanh %435 : vector<2x32xf32>
    %cst_110 = arith.constant 1.000000e+00 : f32
    %437 = vector.broadcast %cst_110 : f32 to vector<2x32xf32>
    %438 = arith.subf %437, %431 : vector<2x32xf32>
    %439 = arith.mulf %438, %436 : vector<2x32xf32>
    %440 = arith.mulf %431, %363 : vector<2x32xf32>
    %441 = arith.addf %439, %440 : vector<2x32xf32>
    %442 = vector.extract_strided_slice %407 {offsets = [0, 0], sizes = [2, 32], strides = [1, 1]} : vector<2x96xf32> to vector<2x32xf32>
    %443 = vector.extract_strided_slice %415 {offsets = [0, 0], sizes = [2, 32], strides = [1, 1]} : vector<2x96xf32> to vector<2x32xf32>
    %444 = arith.addf %442, %443 : vector<2x32xf32>
    %445 = arith.negf %444 : vector<2x32xf32>
    %446 = math.exp %445 : vector<2x32xf32>
    %cst_111 = arith.constant 1.000000e+00 : f32
    %447 = vector.broadcast %cst_111 : f32 to vector<2x32xf32>
    %448 = arith.addf %447, %446 : vector<2x32xf32>
    %449 = arith.divf %447, %448 : vector<2x32xf32>
    %450 = vector.extract_strided_slice %407 {offsets = [0, 32], sizes = [2, 32], strides = [1, 1]} : vector<2x96xf32> to vector<2x32xf32>
    %451 = vector.extract_strided_slice %415 {offsets = [0, 32], sizes = [2, 32], strides = [1, 1]} : vector<2x96xf32> to vector<2x32xf32>
    %452 = arith.addf %450, %451 : vector<2x32xf32>
    %453 = arith.negf %452 : vector<2x32xf32>
    %454 = math.exp %453 : vector<2x32xf32>
    %cst_112 = arith.constant 1.000000e+00 : f32
    %455 = vector.broadcast %cst_112 : f32 to vector<2x32xf32>
    %456 = arith.addf %455, %454 : vector<2x32xf32>
    %457 = arith.divf %455, %456 : vector<2x32xf32>
    %458 = vector.extract_strided_slice %407 {offsets = [0, 64], sizes = [2, 32], strides = [1, 1]} : vector<2x96xf32> to vector<2x32xf32>
    %459 = vector.extract_strided_slice %415 {offsets = [0, 64], sizes = [2, 32], strides = [1, 1]} : vector<2x96xf32> to vector<2x32xf32>
    %460 = arith.mulf %449, %459 : vector<2x32xf32>
    %461 = arith.addf %458, %460 : vector<2x32xf32>
    %462 = math.tanh %461 : vector<2x32xf32>
    %cst_113 = arith.constant 1.000000e+00 : f32
    %463 = vector.broadcast %cst_113 : f32 to vector<2x32xf32>
    %464 = arith.subf %463, %457 : vector<2x32xf32>
    %465 = arith.mulf %464, %462 : vector<2x32xf32>
    %466 = arith.mulf %457, %389 : vector<2x32xf32>
    %467 = arith.addf %465, %466 : vector<2x32xf32>
    %468 = arith.index_cast %c5_i32 : i32 to index
    %c0_114 = arith.constant 0 : index
    %c0_115 = arith.constant 0 : index
    %469 = vector.load %arg7[%468, %c0_114, %c0_115] : memref<8x2x32xf32, #tpu.memory_space<vmem>>, vector<1x2x32xf32>
    %470 = vector.shape_cast %469 : vector<1x2x32xf32> to vector<2x32xf32>
    %471 = vector.shape_cast %441 : vector<2x32xf32> to vector<1x2x32xf32>
    tpu.vector_store %arg7[%468, %c0_114, %c0_115], %471 {strides = array<i32>} : memref<8x2x32xf32, #tpu.memory_space<vmem>>, vector<1x2x32xf32>,
    %c7_i32_116 = arith.constant 7 : i32
    %472 = arith.subi %c7_i32_116, %c5_i32 : i32
    %473 = arith.index_cast %472 : i32 to index
    %c0_117 = arith.constant 0 : index
    %c0_118 = arith.constant 0 : index
    %474 = vector.load %arg8[%473, %c0_117, %c0_118] : memref<8x2x32xf32, #tpu.memory_space<vmem>>, vector<1x2x32xf32>
    %475 = vector.shape_cast %474 : vector<1x2x32xf32> to vector<2x32xf32>
    %476 = vector.shape_cast %467 : vector<2x32xf32> to vector<1x2x32xf32>
    tpu.vector_store %arg8[%473, %c0_117, %c0_118], %476 {strides = array<i32>} : memref<8x2x32xf32, #tpu.memory_space<vmem>>, vector<1x2x32xf32>,
    %c6_i32 = arith.constant 6 : i32
    %477 = arith.index_cast %c6_i32 : i32 to index
    %c0_119 = arith.constant 0 : index
    %c0_120 = arith.constant 0 : index
    %478 = vector.load %arg1[%477, %c0_119, %c0_120] : memref<8x2x96xbf16, #tpu.memory_space<vmem>>, vector<1x2x96xbf16>
    %479 = vector.shape_cast %478 : vector<1x2x96xbf16> to vector<2x96xbf16>
    %480 = arith.extf %479 : vector<2x96xbf16> to vector<2x96xf32>
    %c7_i32_121 = arith.constant 7 : i32
    %481 = arith.subi %c7_i32_121, %c6_i32 : i32
    %482 = arith.index_cast %481 : i32 to index
    %c0_122 = arith.constant 0 : index
    %c0_123 = arith.constant 0 : index
    %483 = vector.load %arg2[%482, %c0_122, %c0_123] : memref<8x2x96xbf16, #tpu.memory_space<vmem>>, vector<1x2x96xbf16>
    %484 = vector.shape_cast %483 : vector<1x2x96xbf16> to vector<2x96xbf16>
    %485 = arith.extf %484 : vector<2x96xbf16> to vector<2x96xf32>
    %486 = arith.truncf %441 : vector<2x32xf32> to vector<2x32xbf16>
    %cst_124 = arith.constant dense<0.000000e+00> : vector<2x96xf32>
    %487 = tpu.matmul %486, %3, %cst_124 {dimension_numbers = #tpu.dot_dimension_numbers<[1], [0], [0], [1], [0, 0, 1, 1], [], []>} : vector<2x32xbf16>, vector<32x96xbf16>, vector<2x96xf32> -> vector<2x96xf32>
    %488 = vector.broadcast %5 : vector<1x96xf32> to vector<2x96xf32>
    %489 = arith.addf %487, %488 : vector<2x96xf32>
    %490 = arith.truncf %467 : vector<2x32xf32> to vector<2x32xbf16>
    %cst_125 = arith.constant dense<0.000000e+00> : vector<2x96xf32>
    %491 = tpu.matmul %490, %4, %cst_125 {dimension_numbers = #tpu.dot_dimension_numbers<[1], [0], [0], [1], [0, 0, 1, 1], [], []>} : vector<2x32xbf16>, vector<32x96xbf16>, vector<2x96xf32> -> vector<2x96xf32>
    %492 = vector.broadcast %6 : vector<1x96xf32> to vector<2x96xf32>
    %493 = arith.addf %491, %492 : vector<2x96xf32>
    %494 = vector.extract_strided_slice %480 {offsets = [0, 0], sizes = [2, 32], strides = [1, 1]} : vector<2x96xf32> to vector<2x32xf32>
    %495 = vector.extract_strided_slice %489 {offsets = [0, 0], sizes = [2, 32], strides = [1, 1]} : vector<2x96xf32> to vector<2x32xf32>
    %496 = arith.addf %494, %495 : vector<2x32xf32>
    %497 = arith.negf %496 : vector<2x32xf32>
    %498 = math.exp %497 : vector<2x32xf32>
    %cst_126 = arith.constant 1.000000e+00 : f32
    %499 = vector.broadcast %cst_126 : f32 to vector<2x32xf32>
    %500 = arith.addf %499, %498 : vector<2x32xf32>
    %501 = arith.divf %499, %500 : vector<2x32xf32>
    %502 = vector.extract_strided_slice %480 {offsets = [0, 32], sizes = [2, 32], strides = [1, 1]} : vector<2x96xf32> to vector<2x32xf32>
    %503 = vector.extract_strided_slice %489 {offsets = [0, 32], sizes = [2, 32], strides = [1, 1]} : vector<2x96xf32> to vector<2x32xf32>
    %504 = arith.addf %502, %503 : vector<2x32xf32>
    %505 = arith.negf %504 : vector<2x32xf32>
    %506 = math.exp %505 : vector<2x32xf32>
    %cst_127 = arith.constant 1.000000e+00 : f32
    %507 = vector.broadcast %cst_127 : f32 to vector<2x32xf32>
    %508 = arith.addf %507, %506 : vector<2x32xf32>
    %509 = arith.divf %507, %508 : vector<2x32xf32>
    %510 = vector.extract_strided_slice %480 {offsets = [0, 64], sizes = [2, 32], strides = [1, 1]} : vector<2x96xf32> to vector<2x32xf32>
    %511 = vector.extract_strided_slice %489 {offsets = [0, 64], sizes = [2, 32], strides = [1, 1]} : vector<2x96xf32> to vector<2x32xf32>
    %512 = arith.mulf %501, %511 : vector<2x32xf32>
    %513 = arith.addf %510, %512 : vector<2x32xf32>
    %514 = math.tanh %513 : vector<2x32xf32>
    %cst_128 = arith.constant 1.000000e+00 : f32
    %515 = vector.broadcast %cst_128 : f32 to vector<2x32xf32>
    %516 = arith.subf %515, %509 : vector<2x32xf32>
    %517 = arith.mulf %516, %514 : vector<2x32xf32>
    %518 = arith.mulf %509, %441 : vector<2x32xf32>
    %519 = arith.addf %517, %518 : vector<2x32xf32>
    %520 = vector.extract_strided_slice %485 {offsets = [0, 0], sizes = [2, 32], strides = [1, 1]} : vector<2x96xf32> to vector<2x32xf32>
    %521 = vector.extract_strided_slice %493 {offsets = [0, 0], sizes = [2, 32], strides = [1, 1]} : vector<2x96xf32> to vector<2x32xf32>
    %522 = arith.addf %520, %521 : vector<2x32xf32>
    %523 = arith.negf %522 : vector<2x32xf32>
    %524 = math.exp %523 : vector<2x32xf32>
    %cst_129 = arith.constant 1.000000e+00 : f32
    %525 = vector.broadcast %cst_129 : f32 to vector<2x32xf32>
    %526 = arith.addf %525, %524 : vector<2x32xf32>
    %527 = arith.divf %525, %526 : vector<2x32xf32>
    %528 = vector.extract_strided_slice %485 {offsets = [0, 32], sizes = [2, 32], strides = [1, 1]} : vector<2x96xf32> to vector<2x32xf32>
    %529 = vector.extract_strided_slice %493 {offsets = [0, 32], sizes = [2, 32], strides = [1, 1]} : vector<2x96xf32> to vector<2x32xf32>
    %530 = arith.addf %528, %529 : vector<2x32xf32>
    %531 = arith.negf %530 : vector<2x32xf32>
    %532 = math.exp %531 : vector<2x32xf32>
    %cst_130 = arith.constant 1.000000e+00 : f32
    %533 = vector.broadcast %cst_130 : f32 to vector<2x32xf32>
    %534 = arith.addf %533, %532 : vector<2x32xf32>
    %535 = arith.divf %533, %534 : vector<2x32xf32>
    %536 = vector.extract_strided_slice %485 {offsets = [0, 64], sizes = [2, 32], strides = [1, 1]} : vector<2x96xf32> to vector<2x32xf32>
    %537 = vector.extract_strided_slice %493 {offsets = [0, 64], sizes = [2, 32], strides = [1, 1]} : vector<2x96xf32> to vector<2x32xf32>
    %538 = arith.mulf %527, %537 : vector<2x32xf32>
    %539 = arith.addf %536, %538 : vector<2x32xf32>
    %540 = math.tanh %539 : vector<2x32xf32>
    %cst_131 = arith.constant 1.000000e+00 : f32
    %541 = vector.broadcast %cst_131 : f32 to vector<2x32xf32>
    %542 = arith.subf %541, %535 : vector<2x32xf32>
    %543 = arith.mulf %542, %540 : vector<2x32xf32>
    %544 = arith.mulf %535, %467 : vector<2x32xf32>
    %545 = arith.addf %543, %544 : vector<2x32xf32>
    %546 = arith.index_cast %c6_i32 : i32 to index
    %c0_132 = arith.constant 0 : index
    %c0_133 = arith.constant 0 : index
    %547 = vector.load %arg7[%546, %c0_132, %c0_133] : memref<8x2x32xf32, #tpu.memory_space<vmem>>, vector<1x2x32xf32>
    %548 = vector.shape_cast %547 : vector<1x2x32xf32> to vector<2x32xf32>
    %549 = vector.shape_cast %519 : vector<2x32xf32> to vector<1x2x32xf32>
    tpu.vector_store %arg7[%546, %c0_132, %c0_133], %549 {strides = array<i32>} : memref<8x2x32xf32, #tpu.memory_space<vmem>>, vector<1x2x32xf32>,
    %c7_i32_134 = arith.constant 7 : i32
    %550 = arith.subi %c7_i32_134, %c6_i32 : i32
    %551 = arith.index_cast %550 : i32 to index
    %c0_135 = arith.constant 0 : index
    %c0_136 = arith.constant 0 : index
    %552 = vector.load %arg8[%551, %c0_135, %c0_136] : memref<8x2x32xf32, #tpu.memory_space<vmem>>, vector<1x2x32xf32>
    %553 = vector.shape_cast %552 : vector<1x2x32xf32> to vector<2x32xf32>
    %554 = vector.shape_cast %545 : vector<2x32xf32> to vector<1x2x32xf32>
    tpu.vector_store %arg8[%551, %c0_135, %c0_136], %554 {strides = array<i32>} : memref<8x2x32xf32, #tpu.memory_space<vmem>>, vector<1x2x32xf32>,
    %c7_i32_137 = arith.constant 7 : i32
    %555 = arith.index_cast %c7_i32_137 : i32 to index
    %c0_138 = arith.constant 0 : index
    %c0_139 = arith.constant 0 : index
    %556 = vector.load %arg1[%555, %c0_138, %c0_139] : memref<8x2x96xbf16, #tpu.memory_space<vmem>>, vector<1x2x96xbf16>
    %557 = vector.shape_cast %556 : vector<1x2x96xbf16> to vector<2x96xbf16>
    %558 = arith.extf %557 : vector<2x96xbf16> to vector<2x96xf32>
    %c7_i32_140 = arith.constant 7 : i32
    %559 = arith.subi %c7_i32_140, %c7_i32_137 : i32
    %560 = arith.index_cast %559 : i32 to index
    %c0_141 = arith.constant 0 : index
    %c0_142 = arith.constant 0 : index
    %561 = vector.load %arg2[%560, %c0_141, %c0_142] : memref<8x2x96xbf16, #tpu.memory_space<vmem>>, vector<1x2x96xbf16>
    %562 = vector.shape_cast %561 : vector<1x2x96xbf16> to vector<2x96xbf16>
    %563 = arith.extf %562 : vector<2x96xbf16> to vector<2x96xf32>
    %564 = arith.truncf %519 : vector<2x32xf32> to vector<2x32xbf16>
    %cst_143 = arith.constant dense<0.000000e+00> : vector<2x96xf32>
    %565 = tpu.matmul %564, %3, %cst_143 {dimension_numbers = #tpu.dot_dimension_numbers<[1], [0], [0], [1], [0, 0, 1, 1], [], []>} : vector<2x32xbf16>, vector<32x96xbf16>, vector<2x96xf32> -> vector<2x96xf32>
    %566 = vector.broadcast %5 : vector<1x96xf32> to vector<2x96xf32>
    %567 = arith.addf %565, %566 : vector<2x96xf32>
    %568 = arith.truncf %545 : vector<2x32xf32> to vector<2x32xbf16>
    %cst_144 = arith.constant dense<0.000000e+00> : vector<2x96xf32>
    %569 = tpu.matmul %568, %4, %cst_144 {dimension_numbers = #tpu.dot_dimension_numbers<[1], [0], [0], [1], [0, 0, 1, 1], [], []>} : vector<2x32xbf16>, vector<32x96xbf16>, vector<2x96xf32> -> vector<2x96xf32>
    %570 = vector.broadcast %6 : vector<1x96xf32> to vector<2x96xf32>
    %571 = arith.addf %569, %570 : vector<2x96xf32>
    %572 = vector.extract_strided_slice %558 {offsets = [0, 0], sizes = [2, 32], strides = [1, 1]} : vector<2x96xf32> to vector<2x32xf32>
    %573 = vector.extract_strided_slice %567 {offsets = [0, 0], sizes = [2, 32], strides = [1, 1]} : vector<2x96xf32> to vector<2x32xf32>
    %574 = arith.addf %572, %573 : vector<2x32xf32>
    %575 = arith.negf %574 : vector<2x32xf32>
    %576 = math.exp %575 : vector<2x32xf32>
    %cst_145 = arith.constant 1.000000e+00 : f32
    %577 = vector.broadcast %cst_145 : f32 to vector<2x32xf32>
    %578 = arith.addf %577, %576 : vector<2x32xf32>
    %579 = arith.divf %577, %578 : vector<2x32xf32>
    %580 = vector.extract_strided_slice %558 {offsets = [0, 32], sizes = [2, 32], strides = [1, 1]} : vector<2x96xf32> to vector<2x32xf32>
    %581 = vector.extract_strided_slice %567 {offsets = [0, 32], sizes = [2, 32], strides = [1, 1]} : vector<2x96xf32> to vector<2x32xf32>
    %582 = arith.addf %580, %581 : vector<2x32xf32>
    %583 = arith.negf %582 : vector<2x32xf32>
    %584 = math.exp %583 : vector<2x32xf32>
    %cst_146 = arith.constant 1.000000e+00 : f32
    %585 = vector.broadcast %cst_146 : f32 to vector<2x32xf32>
    %586 = arith.addf %585, %584 : vector<2x32xf32>
    %587 = arith.divf %585, %586 : vector<2x32xf32>
    %588 = vector.extract_strided_slice %558 {offsets = [0, 64], sizes = [2, 32], strides = [1, 1]} : vector<2x96xf32> to vector<2x32xf32>
    %589 = vector.extract_strided_slice %567 {offsets = [0, 64], sizes = [2, 32], strides = [1, 1]} : vector<2x96xf32> to vector<2x32xf32>
    %590 = arith.mulf %579, %589 : vector<2x32xf32>
    %591 = arith.addf %588, %590 : vector<2x32xf32>
    %592 = math.tanh %591 : vector<2x32xf32>
    %cst_147 = arith.constant 1.000000e+00 : f32
    %593 = vector.broadcast %cst_147 : f32 to vector<2x32xf32>
    %594 = arith.subf %593, %587 : vector<2x32xf32>
    %595 = arith.mulf %594, %592 : vector<2x32xf32>
    %596 = arith.mulf %587, %519 : vector<2x32xf32>
    %597 = arith.addf %595, %596 : vector<2x32xf32>
    %598 = vector.extract_strided_slice %563 {offsets = [0, 0], sizes = [2, 32], strides = [1, 1]} : vector<2x96xf32> to vector<2x32xf32>
    %599 = vector.extract_strided_slice %571 {offsets = [0, 0], sizes = [2, 32], strides = [1, 1]} : vector<2x96xf32> to vector<2x32xf32>
    %600 = arith.addf %598, %599 : vector<2x32xf32>
    %601 = arith.negf %600 : vector<2x32xf32>
    %602 = math.exp %601 : vector<2x32xf32>
    %cst_148 = arith.constant 1.000000e+00 : f32
    %603 = vector.broadcast %cst_148 : f32 to vector<2x32xf32>
    %604 = arith.addf %603, %602 : vector<2x32xf32>
    %605 = arith.divf %603, %604 : vector<2x32xf32>
    %606 = vector.extract_strided_slice %563 {offsets = [0, 32], sizes = [2, 32], strides = [1, 1]} : vector<2x96xf32> to vector<2x32xf32>
    %607 = vector.extract_strided_slice %571 {offsets = [0, 32], sizes = [2, 32], strides = [1, 1]} : vector<2x96xf32> to vector<2x32xf32>
    %608 = arith.addf %606, %607 : vector<2x32xf32>
    %609 = arith.negf %608 : vector<2x32xf32>
    %610 = math.exp %609 : vector<2x32xf32>
    %cst_149 = arith.constant 1.000000e+00 : f32
    %611 = vector.broadcast %cst_149 : f32 to vector<2x32xf32>
    %612 = arith.addf %611, %610 : vector<2x32xf32>
    %613 = arith.divf %611, %612 : vector<2x32xf32>
    %614 = vector.extract_strided_slice %563 {offsets = [0, 64], sizes = [2, 32], strides = [1, 1]} : vector<2x96xf32> to vector<2x32xf32>
    %615 = vector.extract_strided_slice %571 {offsets = [0, 64], sizes = [2, 32], strides = [1, 1]} : vector<2x96xf32> to vector<2x32xf32>
    %616 = arith.mulf %605, %615 : vector<2x32xf32>
    %617 = arith.addf %614, %616 : vector<2x32xf32>
    %618 = math.tanh %617 : vector<2x32xf32>
    %cst_150 = arith.constant 1.000000e+00 : f32
    %619 = vector.broadcast %cst_150 : f32 to vector<2x32xf32>
    %620 = arith.subf %619, %613 : vector<2x32xf32>
    %621 = arith.mulf %620, %618 : vector<2x32xf32>
    %622 = arith.mulf %613, %545 : vector<2x32xf32>
    %623 = arith.addf %621, %622 : vector<2x32xf32>
    %624 = arith.index_cast %c7_i32_137 : i32 to index
    %c0_151 = arith.constant 0 : index
    %c0_152 = arith.constant 0 : index
    %625 = vector.load %arg7[%624, %c0_151, %c0_152] : memref<8x2x32xf32, #tpu.memory_space<vmem>>, vector<1x2x32xf32>
    %626 = vector.shape_cast %625 : vector<1x2x32xf32> to vector<2x32xf32>
    %627 = vector.shape_cast %597 : vector<2x32xf32> to vector<1x2x32xf32>
    tpu.vector_store %arg7[%624, %c0_151, %c0_152], %627 {strides = array<i32>} : memref<8x2x32xf32, #tpu.memory_space<vmem>>, vector<1x2x32xf32>,
    %c7_i32_153 = arith.constant 7 : i32
    %628 = arith.subi %c7_i32_153, %c7_i32_137 : i32
    %629 = arith.index_cast %628 : i32 to index
    %c0_154 = arith.constant 0 : index
    %c0_155 = arith.constant 0 : index
    %630 = vector.load %arg8[%629, %c0_154, %c0_155] : memref<8x2x32xf32, #tpu.memory_space<vmem>>, vector<1x2x32xf32>
    %631 = vector.shape_cast %630 : vector<1x2x32xf32> to vector<2x32xf32>
    %632 = vector.shape_cast %623 : vector<2x32xf32> to vector<1x2x32xf32>
    tpu.vector_store %arg8[%629, %c0_154, %c0_155], %632 {strides = array<i32>} : memref<8x2x32xf32, #tpu.memory_space<vmem>>, vector<1x2x32xf32>,
    %c8_i32 = arith.constant 8 : i32
    %c0_156 = arith.constant 0 : index
    %c0_157 = arith.constant 0 : index
    %633 = vector.load %arg9[%c0_156, %c0_157] : memref<2x32xf32, #tpu.memory_space<vmem>>, vector<2x32xf32>
    tpu.vector_store %arg9[%c0_156, %c0_157], %597 {strides = array<i32>} : memref<2x32xf32, #tpu.memory_space<vmem>>, vector<2x32xf32>,
    %c0_158 = arith.constant 0 : index
    %c0_159 = arith.constant 0 : index
    %634 = vector.load %arg10[%c0_158, %c0_159] : memref<2x32xf32, #tpu.memory_space<vmem>>, vector<2x32xf32>
    tpu.vector_store %arg10[%c0_158, %c0_159], %623 {strides = array<i32>} : memref<2x32xf32, #tpu.memory_space<vmem>>, vector<2x32xf32>,
    return
  }
  func.func @transform_0(%arg0: i32) -> (i32, i32, i32) {
    %c0_i32 = arith.constant 0 : i32
    %c0_i32_0 = arith.constant 0 : i32
    %c0_i32_1 = arith.constant 0 : i32
    return %arg0, %c0_i32, %c0_i32_0 : i32, i32, i32
  }
  func.func @transform_1(%arg0: i32) -> (i32, i32, i32) {
    %c0_i32 = arith.constant 0 : i32
    %0 = arith.subi %c0_i32, %arg0 : i32
    %c0_i32_0 = arith.constant 0 : i32
    %c0_i32_1 = arith.constant 0 : i32
    %c0_i32_2 = arith.constant 0 : i32
    return %0, %c0_i32_0, %c0_i32_1 : i32, i32, i32
  }
  func.func @transform_2(%arg0: i32) -> (i32, i32) {
    %c0_i32 = arith.constant 0 : i32
    %c0_i32_0 = arith.constant 0 : i32
    %c0_i32_1 = arith.constant 0 : i32
    return %c0_i32, %c0_i32_0 : i32, i32
  }
  func.func @transform_3(%arg0: i32) -> (i32, i32) {
    %c0_i32 = arith.constant 0 : i32
    %c0_i32_0 = arith.constant 0 : i32
    %c0_i32_1 = arith.constant 0 : i32
    return %c0_i32, %c0_i32_0 : i32, i32
  }
  func.func @transform_4(%arg0: i32) -> (i32, i32) {
    %c0_i32 = arith.constant 0 : i32
    %c0_i32_0 = arith.constant 0 : i32
    %c0_i32_1 = arith.constant 0 : i32
    return %c0_i32, %c0_i32_0 : i32, i32
  }
  func.func @transform_5(%arg0: i32) -> (i32, i32) {
    %c0_i32 = arith.constant 0 : i32
    %c0_i32_0 = arith.constant 0 : i32
    %c0_i32_1 = arith.constant 0 : i32
    return %c0_i32, %c0_i32_0 : i32, i32
  }
  func.func @transform_6(%arg0: i32) -> (i32, i32, i32) {
    %c0_i32 = arith.constant 0 : i32
    %c0_i32_0 = arith.constant 0 : i32
    %c0_i32_1 = arith.constant 0 : i32
    return %arg0, %c0_i32, %c0_i32_0 : i32, i32, i32
  }
  func.func @transform_7(%arg0: i32) -> (i32, i32, i32) {
    %c0_i32 = arith.constant 0 : i32
    %0 = arith.subi %c0_i32, %arg0 : i32
    %c0_i32_0 = arith.constant 0 : i32
    %c0_i32_1 = arith.constant 0 : i32
    %c0_i32_2 = arith.constant 0 : i32
    return %0, %c0_i32_0, %c0_i32_1 : i32, i32, i32
  }
}

</mosaic_0001>

<bundles_post_ra>
// kernel: bigru_forward.2
= control target key start
LH: loop header
LB: loop body
LE: loop exit
PB: predicated region body
PF: predicated region fallthrough
CT: control target
= control target key end

     0   :  { %v205_v0 = vmov 0.0   ;;  %vm206_vm0 = vmmov 0   ;;  %vm43_vm1 = vcmask 130048   ;;  %vm96_vm2 = vcmask 781312   ;;  %s276_s1 = inlined_call_operand.vmem [shape: bf16[16,96], index: 1, kind: input, shape index: {}]   ;;  %s277_s2 = inlined_call_operand.vmem [shape: bf16[16,96], index: 2, kind: input, shape index: {}]   ;;  %s278_s0 = inlined_call_operand.vmem [shape: f32[16,16], index: 0, kind: input, shape index: {}]   ;;  %s279_s3 = inlined_call_operand.vmem [shape: f32[1,96], index: 3, kind: input, shape index: {}]   ;;  %s280_s4 = inlined_call_operand.vmem [shape: f32[1,96], index: 4, kind: input, shape index: {}]   ;;  %s281_s5 = inlined_call_operand.vmem [shape: bf16[16,96], index: 5, kind: output, shape index: {0}]   ;;  %s282_s6 = inlined_call_operand.vmem [shape: bf16[16,96], index: 6, kind: output, shape index: {1}]  }
   0x1   :  { %189 = vmatprep.subr.bf16.mxu0 %v205_v0  ;;  %195 = vmatprep.subr.bf16.mxu1 %v205_v0  ;;  %v203_v1 = vld [vmem:[%s276_s1] sm:$0xff]   ;;  %v24_v4 = vld [vmem:[%s278_s0 + $0x8] sm:$0xff] }
   0x2   :  { %v204_v2 = vld [vmem:[%s277_s2] sm:$0xff]   ;;  %191 = vmatprep.mubr.msk.bf16.mxu0 %vm206_vm0, %v205_v0  ;;  %197 = vmatprep.mubr.msk.bf16.mxu1 %vm206_vm0, %v205_v0 }
   0x3   :  { %190 = vmatpush3.bf16.msra.mxu0 %v203_v1  ;;  %v23_v3 = vld [vmem:[%s278_s0] sm:$0xff]  ;;  %196 = vmatpush3.bf16.msra.mxu1 %v204_v2 }
   0x4   :  { %v25_v5 = vpack.c.bf16 %v24_v4, %v23_v3  ;;  %v171_v6 = vld [vmem:[%s279_s3] ss:$0 sm:$0xff] }
   0x5   :  { %v176_v7 = vld [vmem:[%s280_s4] ss:$0 sm:$0xff] }
   0x6   :  { %192 = vmatmul.mubr.msk.bf16.vlgmr.msra.gmra.mxu0 %vm43_vm1, %v25_v5  ;;  %198 = vmatmul.mubr.msk.bf16.vlgmr.msra.gmra.mxu1 %vm43_vm1, %v25_v5 }
  0xc6   :  { %v81_v8 = vpop.f32.mrf.mxu0  ;;  %v146_v10 = vpop.f32.mrf.mxu1 }
  0xc7   :  { %v82_v9 = vadd.f32 %v171_v6, %v81_v8  ;;  %v147_v11 = vadd.f32 %v176_v7, %v146_v10 }
  0xc8   :  { %v193_v12 = vpop.f32.mrf.mxu0  ;;  %v199_v14 = vpop.f32.mrf.mxu1 }
  0xc9   :  { %v181_v13 = vpack.c.bf16 %v82_v9, %v82_v9  ;;  %v183_v15 = vpack.c.bf16 %v147_v11, %v147_v11 }
  0xca   :  { %v84_v16 = vpop.f32.mrf.mxu0  ;;  %v149_v18 = vpop.f32.mrf.mxu1 }
  0xcb   :  { %97 = vst.msk [vmem:[%s281_s5] sm:$0xf] %vm96_vm2, %v181_v13  ;;  %v85_v17 = vadd.f32 %v171_v6, %v84_v16  ;;  %161 = vst.msk [vmem:[%s282_s6] sm:$0xf] %vm96_vm2, %v183_v15  ;;  %v150_v19 = vadd.f32 %v176_v7, %v149_v18 }
  0xcc   :  { %v194_v20 = vpop.f32.mrf.mxu0  ;;  %v200_v22 = vpop.f32.mrf.mxu1 }
  0xcd   :  { %v182_v21 = vpack.c.bf16 %v85_v17, %v85_v17  ;;  %v184_v23 = vpack.c.bf16 %v150_v19, %v150_v19 }
  0xcf   :  { %98 = vst.msk [vmem:[%s281_s5 + $0x4] sm:$0xf] %vm96_vm2, %v182_v21  ;;  %162 = vst.msk [vmem:[%s282_s6 + $0x4] sm:$0xf] %vm96_vm2, %v184_v23 }

// kernel: bigru_forward.3
= control target key start
LH: loop header
LB: loop body
LE: loop exit
PB: predicated region body
PF: predicated region fallthrough
CT: control target
= control target key end

     0   :  { %vm63_vm0 = vcmask 254976   ;;  %v2049_v0 = vmov 0.0   ;;  %vm2050_vm1 = vmmov 0   ;;  %vm102_vm2 = vcmask 261120   ;;  %s2052_s11 = smov 64   ;;  %s2053_s16 = smov 32   ;;  %s2583_s2 = inlined_call_operand.vmem [shape: bf16[32,96], index: 2, kind: input, shape index: {}]   ;;  %s2584_s3 = inlined_call_operand.vmem [shape: bf16[32,96], index: 3, kind: input, shape index: {}]   ;;  %s2585_s4 = inlined_call_operand.vmem [shape: f32[1,96], index: 4, kind: input, shape index: {}]   ;;  %s2586_s5 = inlined_call_operand.vmem [shape: f32[1,96], index: 5, kind: input, shape index: {}]   ;;  %s2587_s0 = inlined_call_operand.vmem [shape: bf16[8,2,96], index: 0, kind: input, shape index: {}]   ;;  %s2588_s1 = inlined_call_operand.vmem [shape: bf16[8,2,96], index: 1, kind: input, shape index: {}]   ;;  %s2589_s6 = inlined_call_operand.vmem [shape: f32[8,2,32], index: 6, kind: output, shape index: {0}]   ;;  %s2590_s7 = inlined_call_operand.vmem [shape: f32[8,2,32], index: 7, kind: output, shape index: {1}]  }
   0x1   :  { %1813 = vmatprep.subr.bf16.mxu0 %v2049_v0  ;;  %1821 = vmatprep.subr.bf16.mxu1 %v2049_v0  ;;  %v2100_v1 = vld [vmem:[%s2583_s2 + $0x8] sm:$0xff]   ;;  %64 = vst.msk [vmem:[#allocation2] sm:$0x3] %vm63_vm0, %v2049_v0  ;;  %65 = vst.msk [vmem:[#allocation3] sm:$0x3] %vm63_vm0, %v2049_v0  ;;  %v2119_v3 = vld [vmem:[%s2583_s2] sm:$0xff]   ;;  %v219_v11 = vlaneseq }
   0x2   :  { %v2109_v2 = vld [vmem:[%s2584_s3 + $0x8] sm:$0xff]   ;;  %1817 = vmatprep.mubr.msk.bf16.mxu0 %vm2050_vm1, %v2049_v0  ;;  %1825 = vmatprep.mubr.msk.bf16.mxu1 %vm2050_vm1, %v2049_v0  ;;  %v2126_v4 = vld [vmem:[%s2584_s3] sm:$0xff]   ;;  %v2051_v9 = vmov 1983009808   ;;  %s2054_s17 = smov 96  }
   0x3   :  { %1814 = vmatpush3.bf16.msra.mxu0 %v2100_v1  ;;  %1822 = vmatpush3.bf16.msra.mxu1 %v2109_v2  ;;  %v217_v10 = vunpack.c.l.s4 %v2051_v9  ;;  %v220_v13 = vshrl.u32 %v219_v11, 7  ;;  %v2158_v14 = vld [vmem:[%s2585_s4] ss:$0 sm:$0xff]  ;;  %v1699_v31 = vld [vmem:[%s2588_s1 + $0x7] sm:$0x1] }
   0x4   :  { %1815 = vmatprep.subr.bf16.mxu0 %v2049_v0  ;;  %1823 = vmatprep.subr.bf16.mxu1 %v2049_v0  ;;  %v2163_v15 = vld [vmem:[%s2586_s5] ss:$0 sm:$0xff]  ;;  %v82_v33 = vunpack.c.l.bf16 %v1699_v31 }
   0x5   :  { %v218_v12 = vunpack.c.0.s8 %v217_v10  ;;  %v78_v29 = vld [vmem:[%s2587_s0] sm:$0x1] }
   0x6   :  { %v79_v30 = vunpack.c.l.bf16 %v78_v29  ;;  %v1712_v29 = vld [vmem:[%s2588_s1 + $0x6] sm:$0x1] }
   0x7   :  { %1816 = vmatpush3.bf16.msra.mxu0 %v2119_v3  ;;  %1824 = vmatpush3.bf16.msra.mxu1 %v2126_v4  ;;  %v2165_v16 = vsub.s32 %v218_v12, %v220_v13  ;;  %v327_v31 = vunpack.c.l.bf16 %v1712_v29 }
   0x8   :  { %v2131_v5 = vld [vmem:[#allocation2] sm:$0x3]  ;;  %v2133_v6 = vld [vmem:[#allocation3] sm:$0x3]  ;;  %1829 = vmatprep.subr.bf16.mxu0 %v2049_v0  ;;  %1837 = vmatprep.subr.bf16.mxu1 %v2049_v0 }
   0x9   :  { %v83_v7 = vpack.c.bf16 %v2131_v5, %v2131_v5  ;;  %v146_v8 = vpack.c.bf16 %v2133_v6, %v2133_v6  ;;  %v246_v47 = vrot.slane %v2131_v5, %v2165_v16  ;;  %v290_v48 = vrot.slane %v2133_v6, %v2165_v16 }
   0xb   :  { %1818 = vmatmul.mubr.msk.bf16.vlgmr.msra.gmra.mxu0 %vm102_vm2, %v83_v7  ;;  %1826 = vmatmul.mubr.msk.bf16.vlgmr.msra.gmra.mxu1 %vm102_vm2, %v146_v8 }
   0xc   :  { %1830 = vmatpush3.bf16.msra.mxu0 %v2100_v1  ;;  %1838 = vmatpush3.bf16.msra.mxu1 %v2109_v2 }
   0xd   :  { %1831 = vmatprep.subr.bf16.mxu0 %v2049_v0  ;;  %1833 = vmatprep.mubr.msk.bf16.mxu0 %vm2050_vm1, %v2049_v0 }
   0xe   :  { %1839 = vmatprep.subr.bf16.mxu1 %v2049_v0  ;;  %1841 = vmatprep.mubr.msk.bf16.mxu1 %vm2050_vm1, %v2049_v0 }
  0x10   :  { %1832 = vmatpush3.bf16.msra.mxu0 %v2119_v3  ;;  %1840 = vmatpush3.bf16.msra.mxu1 %v2126_v4 }
  0x11   :  { %1845 = vmatprep.subr.bf16.mxu0 %v2049_v0  ;;  %1853 = vmatprep.subr.bf16.mxu1 %v2049_v0 }
  0xcb   :  { %v140_v17 = vpop.f32.mrf.mxu0  ;;  %v202_v18 = vpop.f32.mrf.mxu1 }
  0xcc   :  { %v141_v19 = vadd.f32 %v2158_v14, %v140_v17  ;;  %v203_v20 = vadd.f32 %v2163_v15, %v202_v18 }
  0xcd   :  { %v1819_v21 = vpop.f32.mrf.mxu0  ;;  %v1827_v22 = vpop.f32.mrf.mxu1 }
  0xce   :  { %v222_v23 = vrot.slane %v141_v19, %v2165_v16  ;;  %v266_v26 = vrot.slane %v203_v20, %v2165_v16  ;;  %v208_v32 = vadd.f32 %v141_v19, %v79_v30  ;;  %v252_v35 = vadd.f32 %v203_v20, %v82_v33 }
  0xcf   :  { %v143_v24 = vpop.f32.mrf.mxu0  ;;  %v205_v25 = vpop.f32.mrf.mxu1 }
  0xd0   :  { %223 = vrot.lane.b32.xlu0 %v222_v23, %s2052_s11  ;;  %v1708_v34 = vmul.f32 -1.442695, %v208_v32  ;;  %v1709_v36 = vmul.f32 -1.442695, %v252_v35 }
  0xd1   :  { %v1820_v27 = vpop.f32.mrf.mxu0  ;;  %v1828_v28 = vpop.f32.mrf.mxu1 }
  0xd2   :  { %1951 = vpow2.f32 %v1708_v34  ;;  %v1711_v27 = vld [vmem:[%s2587_s0 + $0x1] sm:$0x1] }
  0xd3   :  { %1953 = vpow2.f32 %v1709_v36  ;;  %v324_v28 = vunpack.c.l.bf16 %v1711_v27 }
  0xd4   :  { %267 = vrot.lane.b32.xlu0 %v266_v26, %s2052_s11 }
  0xdf   :  { %v1952_v37 = vpop.eup %1951 }
  0xe0   :  { %v212_v38 = vadd.f32 1.0, %v1952_v37  ;;  %v1954_v39 = vpop.eup %1953 }
  0xe1   :  { %v256_v40 = vadd.f32 1.0, %v1954_v39 }
  0xe2   :  { %1955 = vrcp.f32 %v212_v38 }
  0xe3   :  { %1957 = vrcp.f32 %v256_v40 }
  0xef   :  { %v1956_v41 = vpop.eup %1955 }
  0xf0   :  { %v1958_v44 = vpop.eup %1957  ;;  %v233_v56 = vsub.f32 1.0, %v1956_v41 }
  0xf1   :  { %v277_v62 = vsub.f32 1.0, %v1958_v44 }
 0x142   :  { %v224_v42 = vpop.permute.xlu0 %223 }
 0x143   :  { %v226_v43 = vmul.f32 %v1956_v41, %v224_v42 }
 0x145   :  { %228 = vrot.lane.b32.xlu1 %v226_v43, %s2052_s11 }
 0x146   :  { %v268_v45 = vpop.permute.xlu0 %267 }
 0x147   :  { %v270_v46 = vmul.f32 %v1958_v44, %v268_v45 }
 0x149   :  { %272 = vrot.lane.b32.xlu1 %v270_v46, %s2052_s11 }
 0x14d   :  { %247 = vrot.lane.b32.xlu1 %v246_v47, %s2053_s16 }
 0x151   :  { %291 = vrot.lane.b32.xlu1 %v290_v48, %s2053_s16 }
 0x1b7   :  { %v229_v49 = vpop.permute.xlu1 %228 }
 0x1b8   :  { %v231_v50 = vadd.f32 %v229_v49, %v79_v30 }
 0x1ba   :  { %1959 = vtanh.f32 %v231_v50 }
 0x1bb   :  { %v273_v51 = vpop.permute.xlu1 %272 }
 0x1bc   :  { %v275_v52 = vadd.f32 %v273_v51, %v82_v33 }
 0x1be   :  { %1961 = vtanh.f32 %v275_v52 }
 0x1bf   :  { %v248_v55 = vpop.permute.xlu1 %247 }
 0x1c0   :  { %v250_v58 = vmul.f32 %v1956_v41, %v248_v55 }
 0x1c3   :  { %v292_v60 = vpop.permute.xlu1 %291 }
 0x1c4   :  { %v294_v5 = vmul.f32 %v1958_v44, %v292_v60 }
 0x1c7   :  { %v1960_v53 = vpop.eup %1959 }
 0x1c8   :  { %235 = vrot.lane.b32.xlu0 %v1960_v53, %s2054_s17 }
 0x1cb   :  { %v1962_v54 = vpop.eup %1961 }
 0x1cc   :  { %279 = vrot.lane.b32.xlu0 %v1962_v54, %s2054_s17 }
 0x23a   :  { %v236_v57 = vpop.permute.xlu0 %235 }
 0x23b   :  { %v238_v59 = vmul.f32 %v236_v57, %v233_v56 }
 0x23d   :  { %v2187_v61 = vadd.f32 %v250_v58, %v238_v59 }
 0x23e   :  { %v280_v63 = vpop.permute.xlu0 %279 }
 0x23f   :  { %v282_v6 = vmul.f32 %v280_v63, %v277_v62  ;;  %v328_v7 = vpack.c.bf16 %v2187_v61, %v2187_v61 }
 0x241   :  { %v2191_v8 = vadd.f32 %v294_v5, %v282_v6  ;;  %330 = vrot.lane.b32.xlu0 %v328_v7, %s2054_s17 }
 0x243   :  { %v375_v9 = vpack.c.bf16 %v2191_v8, %v2191_v8 }
 0x245   :  { %377 = vrot.lane.b32.xlu1 %v375_v9, %s2054_s17 }
 0x2b3   :  { %v331_v10 = vpop.permute.xlu0 %330 }
 0x2b4   :  { %1834 = vmatmul.mubr.msk.bf16.vlgmr.msra.gmra.mxu0 %vm102_vm2, %v331_v10 }
 0x2b5   :  { %1846 = vmatpush3.bf16.msra.mxu0 %v2100_v1  ;;  %1849 = vmatprep.mubr.msk.bf16.mxu0 %vm2050_vm1, %v2049_v0 }
 0x2b6   :  { %1847 = vmatprep.subr.bf16.mxu0 %v2049_v0 }
 0x2b7   :  { %v378_v11 = vpop.permute.xlu1 %377 }
 0x2b8   :  { %1842 = vmatmul.mubr.msk.bf16.vlgmr.msra.gmra.mxu1 %vm102_vm2, %v378_v11 }
 0x2b9   :  { %1854 = vmatpush3.bf16.msra.mxu1 %v2109_v2  ;;  %1848 = vmatpush3.bf16.msra.mxu0 %v2119_v3 }
 0x2ba   :  { %1855 = vmatprep.subr.bf16.mxu1 %v2049_v0  ;;  %1857 = vmatprep.mubr.msk.bf16.mxu1 %vm2050_vm1, %v2049_v0 }
 0x2bb   :  { %1861 = vmatprep.subr.bf16.mxu0 %v2049_v0 }
 0x2bd   :  { %1856 = vmatpush3.bf16.msra.mxu1 %v2126_v4 }
 0x2be   :  { %1869 = vmatprep.subr.bf16.mxu1 %v2049_v0 }
 0x374   :  { %v369_v12 = vpop.f32.mrf.mxu0 }
 0x375   :  { %v370_v13 = vadd.f32 %v2158_v14, %v369_v12 }
 0x376   :  { %v1835_v17 = vpop.f32.mrf.mxu0 }
 0x377   :  { %v436_v18 = vrot.slane %v370_v13, %v2165_v16  ;;  %v422_v30 = vadd.f32 %v370_v13, %v324_v28 }
 0x378   :  { %v372_v19 = vpop.f32.mrf.mxu0  ;;  %v416_v20 = vpop.f32.mrf.mxu1 }
 0x379   :  { %v417_v21 = vadd.f32 %v2163_v15, %v416_v20  ;;  %437 = vrot.lane.b32.xlu0 %v436_v18, %s2052_s11  ;;  %v1715_v32 = vmul.f32 -1.442695, %v422_v30 }
 0x37a   :  { %v1836_v22 = vpop.f32.mrf.mxu0  ;;  %v1843_v23 = vpop.f32.mrf.mxu1 }
 0x37b   :  { %v469_v24 = vrot.slane %v417_v21, %v2165_v16  ;;  %v455_v33 = vadd.f32 %v417_v21, %v327_v31  ;;  %1963 = vpow2.f32 %v1715_v32  ;;  %v1719_v23 = vld [vmem:[%s2587_s0 + $0x2] sm:$0x1] }
 0x37c   :  { %v419_v25 = vpop.f32.mrf.mxu1 }
 0x37d   :  { %470 = vrot.lane.b32.xlu1 %v469_v24, %s2052_s11  ;;  %v1716_v34 = vmul.f32 -1.442695, %v455_v33  ;;  %v516_v24 = vunpack.c.l.bf16 %v1719_v23  ;;  %v1720_v25 = vld [vmem:[%s2588_s1 + $0x5] sm:$0x1]  ;;  %v1728_v23 = vld [vmem:[%s2588_s1 + $0x4] sm:$0x1] }
 0x37e   :  { %v1844_v26 = vpop.f32.mrf.mxu1  ;;  %v519_v27 = vunpack.c.l.bf16 %v1720_v25  ;;  %v711_v25 = vunpack.c.l.bf16 %v1728_v23  ;;  %v1736_v23 = vld [vmem:[%s2588_s1 + $0x3] sm:$0x1] }
 0x37f   :  { %1965 = vpow2.f32 %v1716_v34 }
 0x388   :  { %v1964_v35 = vpop.eup %1963 }
 0x389   :  { %v426_v36 = vadd.f32 1.0, %v1964_v35 }
 0x38b   :  { %1967 = vrcp.f32 %v426_v36 }
 0x38c   :  { %v1966_v37 = vpop.eup %1965 }
 0x38d   :  { %v459_v38 = vadd.f32 1.0, %v1966_v37 }
 0x38f   :  { %1969 = vrcp.f32 %v459_v38 }
 0x398   :  { %v1968_v39 = vpop.eup %1967 }
 0x399   :  { %v447_v51 = vsub.f32 1.0, %v1968_v39  ;;  %v453_v53 = vmul.f32 %v1968_v39, %v2187_v61 }
 0x39c   :  { %v1970_v42 = vpop.eup %1969 }
 0x39d   :  { %v480_v56 = vsub.f32 1.0, %v1970_v42  ;;  %v486_v58 = vmul.f32 %v1970_v42, %v2191_v8 }
 0x3eb   :  { %v438_v40 = vpop.permute.xlu0 %437 }
 0x3ec   :  { %v440_v41 = vmul.f32 %v1968_v39, %v438_v40 }
 0x3ee   :  { %442 = vrot.lane.b32.xlu0 %v440_v41, %s2052_s11 }
 0x3ef   :  { %v471_v43 = vpop.permute.xlu1 %470 }
 0x3f0   :  { %v473_v44 = vmul.f32 %v1970_v42, %v471_v43 }
 0x3f2   :  { %475 = vrot.lane.b32.xlu1 %v473_v44, %s2052_s11 }
 0x460   :  { %v443_v45 = vpop.permute.xlu0 %442 }
 0x461   :  { %v445_v46 = vadd.f32 %v443_v45, %v324_v28 }
 0x463   :  { %1971 = vtanh.f32 %v445_v46 }
 0x464   :  { %v476_v47 = vpop.permute.xlu1 %475 }
 0x465   :  { %v478_v48 = vadd.f32 %v476_v47, %v327_v31 }
 0x467   :  { %1973 = vtanh.f32 %v478_v48 }
 0x470   :  { %v1972_v49 = vpop.eup %1971 }
 0x471   :  { %449 = vrot.lane.b32.xlu0 %v1972_v49, %s2054_s17 }
 0x474   :  { %v1974_v50 = vpop.eup %1973 }
 0x475   :  { %482 = vrot.lane.b32.xlu1 %v1974_v50, %s2054_s17 }
 0x4e3   :  { %v450_v52 = vpop.permute.xlu0 %449 }
 0x4e4   :  { %v452_v54 = vmul.f32 %v450_v52, %v447_v51 }
 0x4e6   :  { %v2228_v55 = vadd.f32 %v453_v53, %v452_v54 }
 0x4e7   :  { %v483_v57 = vpop.permute.xlu1 %482 }
 0x4e8   :  { %v485_v59 = vmul.f32 %v483_v57, %v480_v56  ;;  %v520_v60 = vpack.c.bf16 %v2228_v55, %v2228_v55 }
 0x4ea   :  { %v2233_v62 = vadd.f32 %v486_v58, %v485_v59  ;;  %522 = vrot.lane.b32.xlu0 %v520_v60, %s2054_s17 }
 0x4ec   :  { %v567_v63 = vpack.c.bf16 %v2233_v62, %v2233_v62 }
 0x4ee   :  { %569 = vrot.lane.b32.xlu1 %v567_v63, %s2054_s17 }
 0x55c   :  { %v523_v5 = vpop.permute.xlu0 %522 }
 0x55d   :  { %1850 = vmatmul.mubr.msk.bf16.vlgmr.msra.gmra.mxu0 %vm102_vm2, %v523_v5 }
 0x55e   :  { %1862 = vmatpush3.bf16.msra.mxu0 %v2100_v1  ;;  %1865 = vmatprep.mubr.msk.bf16.mxu0 %vm2050_vm1, %v2049_v0 }
 0x55f   :  { %1863 = vmatprep.subr.bf16.mxu0 %v2049_v0 }
 0x560   :  { %v570_v6 = vpop.permute.xlu1 %569 }
 0x561   :  { %1858 = vmatmul.mubr.msk.bf16.vlgmr.msra.gmra.mxu1 %vm102_vm2, %v570_v6 }
 0x562   :  { %1870 = vmatpush3.bf16.msra.mxu1 %v2109_v2  ;;  %1864 = vmatpush3.bf16.msra.mxu0 %v2119_v3 }
 0x563   :  { %1871 = vmatprep.subr.bf16.mxu1 %v2049_v0  ;;  %1873 = vmatprep.mubr.msk.bf16.mxu1 %vm2050_vm1, %v2049_v0 }
 0x564   :  { %1877 = vmatprep.subr.bf16.mxu0 %v2049_v0 }
 0x566   :  { %1872 = vmatpush3.bf16.msra.mxu1 %v2126_v4 }
 0x567   :  { %1885 = vmatprep.subr.bf16.mxu1 %v2049_v0 }
 0x61d   :  { %v561_v7 = vpop.f32.mrf.mxu0 }
 0x61e   :  { %v562_v9 = vadd.f32 %v2158_v14, %v561_v7 }
 0x61f   :  { %v1851_v10 = vpop.f32.mrf.mxu0 }
 0x620   :  { %v628_v11 = vrot.slane %v562_v9, %v2165_v16  ;;  %v614_v26 = vadd.f32 %v562_v9, %v516_v24 }
 0x621   :  { %v564_v12 = vpop.f32.mrf.mxu0  ;;  %v608_v13 = vpop.f32.mrf.mxu1 }
 0x622   :  { %v609_v17 = vadd.f32 %v2163_v15, %v608_v13  ;;  %629 = vrot.lane.b32.xlu0 %v628_v11, %s2052_s11  ;;  %v1723_v28 = vmul.f32 -1.442695, %v614_v26 }
 0x623   :  { %v1852_v18 = vpop.f32.mrf.mxu0  ;;  %v1859_v19 = vpop.f32.mrf.mxu1 }
 0x624   :  { %v661_v20 = vrot.slane %v609_v17, %v2165_v16  ;;  %v647_v29 = vadd.f32 %v609_v17, %v519_v27  ;;  %1975 = vpow2.f32 %v1723_v28 }
 0x625   :  { %v611_v21 = vpop.f32.mrf.mxu1 }
 0x626   :  { %662 = vrot.lane.b32.xlu1 %v661_v20, %s2052_s11  ;;  %v1724_v30 = vmul.f32 -1.442695, %v647_v29  ;;  %v1727_v21 = vld [vmem:[%s2587_s0 + $0x3] sm:$0x1] }
 0x627   :  { %v1860_v22 = vpop.f32.mrf.mxu1 }
 0x628   :  { %1977 = vpow2.f32 %v1724_v30  ;;  %v708_v22 = vunpack.c.l.bf16 %v1727_v21  ;;  %v1735_v21 = vld [vmem:[%s2587_s0 + $0x4] sm:$0x1] }
 0x631   :  { %v1976_v31 = vpop.eup %1975 }
 0x632   :  { %v618_v32 = vadd.f32 1.0, %v1976_v31 }
 0x634   :  { %1979 = vrcp.f32 %v618_v32 }
 0x635   :  { %v1978_v33 = vpop.eup %1977 }
 0x636   :  { %v651_v34 = vadd.f32 1.0, %v1978_v33 }
 0x638   :  { %1981 = vrcp.f32 %v651_v34 }
 0x641   :  { %v1980_v35 = vpop.eup %1979 }
 0x642   :  { %v639_v47 = vsub.f32 1.0, %v1980_v35  ;;  %v645_v49 = vmul.f32 %v1980_v35, %v2228_v55 }
 0x645   :  { %v1982_v38 = vpop.eup %1981 }
 0x646   :  { %v672_v52 = vsub.f32 1.0, %v1982_v38  ;;  %v678_v54 = vmul.f32 %v1982_v38, %v2233_v62 }
 0x694   :  { %v630_v36 = vpop.permute.xlu0 %629 }
 0x695   :  { %v632_v37 = vmul.f32 %v1980_v35, %v630_v36 }
 0x697   :  { %634 = vrot.lane.b32.xlu0 %v632_v37, %s2052_s11 }
 0x698   :  { %v663_v39 = vpop.permute.xlu1 %662 }
 0x699   :  { %v665_v40 = vmul.f32 %v1982_v38, %v663_v39 }
 0x69b   :  { %667 = vrot.lane.b32.xlu1 %v665_v40, %s2052_s11 }
 0x709   :  { %v635_v41 = vpop.permute.xlu0 %634 }
 0x70a   :  { %v637_v42 = vadd.f32 %v635_v41, %v516_v24 }
 0x70c   :  { %1983 = vtanh.f32 %v637_v42 }
 0x70d   :  { %v668_v43 = vpop.permute.xlu1 %667 }
 0x70e   :  { %v670_v44 = vadd.f32 %v668_v43, %v519_v27 }
 0x710   :  { %1985 = vtanh.f32 %v670_v44 }
 0x719   :  { %v1984_v45 = vpop.eup %1983 }
 0x71a   :  { %641 = vrot.lane.b32.xlu0 %v1984_v45, %s2054_s17 }
 0x71d   :  { %v1986_v46 = vpop.eup %1985 }
 0x71e   :  { %674 = vrot.lane.b32.xlu1 %v1986_v46, %s2054_s17 }
 0x78c   :  { %v642_v48 = vpop.permute.xlu0 %641 }
 0x78d   :  { %v644_v50 = vmul.f32 %v642_v48, %v639_v47 }
 0x78f   :  { %v2270_v51 = vadd.f32 %v645_v49, %v644_v50 }
 0x790   :  { %v675_v53 = vpop.permute.xlu1 %674 }
 0x791   :  { %v677_v56 = vmul.f32 %v675_v53, %v672_v52  ;;  %v712_v57 = vpack.c.bf16 %v2270_v51, %v2270_v51 }
 0x793   :  { %v2275_v58 = vadd.f32 %v678_v54, %v677_v56  ;;  %714 = vrot.lane.b32.xlu0 %v712_v57, %s2054_s17 }
 0x795   :  { %v759_v59 = vpack.c.bf16 %v2275_v58, %v2275_v58 }
 0x797   :  { %761 = vrot.lane.b32.xlu1 %v759_v59, %s2054_s17 }
 0x805   :  { %v715_v60 = vpop.permute.xlu0 %714 }
 0x806   :  { %1866 = vmatmul.mubr.msk.bf16.vlgmr.msra.gmra.mxu0 %vm102_vm2, %v715_v60 }
 0x807   :  { %1878 = vmatpush3.bf16.msra.mxu0 %v2100_v1  ;;  %1881 = vmatprep.mubr.msk.bf16.mxu0 %vm2050_vm1, %v2049_v0 }
 0x808   :  { %1879 = vmatprep.subr.bf16.mxu0 %v2049_v0 }
 0x809   :  { %v762_v63 = vpop.permute.xlu1 %761 }
 0x80a   :  { %1874 = vmatmul.mubr.msk.bf16.vlgmr.msra.gmra.mxu1 %vm102_vm2, %v762_v63 }
 0x80b   :  { %1886 = vmatpush3.bf16.msra.mxu1 %v2109_v2  ;;  %1880 = vmatpush3.bf16.msra.mxu0 %v2119_v3 }
 0x80c   :  { %1887 = vmatprep.subr.bf16.mxu1 %v2049_v0  ;;  %1889 = vmatprep.mubr.msk.bf16.mxu1 %vm2050_vm1, %v2049_v0 }
 0x80d   :  { %1893 = vmatprep.subr.bf16.mxu0 %v2049_v0 }
 0x80f   :  { %1888 = vmatpush3.bf16.msra.mxu1 %v2126_v4 }
 0x810   :  { %1901 = vmatprep.subr.bf16.mxu1 %v2049_v0 }
 0x8c6   :  { %v753_v5 = vpop.f32.mrf.mxu0 }
 0x8c7   :  { %v754_v6 = vadd.f32 %v2158_v14, %v753_v5 }
 0x8c8   :  { %v1867_v7 = vpop.f32.mrf.mxu0 }
 0x8c9   :  { %v820_v9 = vrot.slane %v754_v6, %v2165_v16  ;;  %v806_v24 = vadd.f32 %v754_v6, %v708_v22 }
 0x8ca   :  { %v756_v10 = vpop.f32.mrf.mxu0  ;;  %v800_v11 = vpop.f32.mrf.mxu1 }
 0x8cb   :  { %v801_v12 = vadd.f32 %v2163_v15, %v800_v11  ;;  %821 = vrot.lane.b32.xlu0 %v820_v9, %s2052_s11  ;;  %v1731_v26 = vmul.f32 -1.442695, %v806_v24 }
 0x8cc   :  { %v1868_v13 = vpop.f32.mrf.mxu0  ;;  %v1875_v17 = vpop.f32.mrf.mxu1 }
 0x8cd   :  { %v853_v18 = vrot.slane %v801_v12, %v2165_v16  ;;  %v839_v27 = vadd.f32 %v801_v12, %v711_v25  ;;  %1987 = vpow2.f32 %v1731_v26 }
 0x8ce   :  { %v803_v19 = vpop.f32.mrf.mxu1 }
 0x8cf   :  { %854 = vrot.lane.b32.xlu1 %v853_v18, %s2052_s11  ;;  %v1732_v28 = vmul.f32 -1.442695, %v839_v27 }
 0x8d0   :  { %v1876_v20 = vpop.f32.mrf.mxu1 }
 0x8d1   :  { %1989 = vpow2.f32 %v1732_v28 }
 0x8da   :  { %v1988_v29 = vpop.eup %1987 }
 0x8db   :  { %v810_v30 = vadd.f32 1.0, %v1988_v29 }
 0x8dd   :  { %1991 = vrcp.f32 %v810_v30 }
 0x8de   :  { %v1990_v31 = vpop.eup %1989 }
 0x8df   :  { %v843_v32 = vadd.f32 1.0, %v1990_v31 }
 0x8e1   :  { %1993 = vrcp.f32 %v843_v32 }
 0x8ea   :  { %v1992_v33 = vpop.eup %1991 }
 0x8eb   :  { %v831_v45 = vsub.f32 1.0, %v1992_v33  ;;  %v837_v47 = vmul.f32 %v1992_v33, %v2270_v51 }
 0x8ee   :  { %v1994_v36 = vpop.eup %1993 }
 0x8ef   :  { %v864_v50 = vsub.f32 1.0, %v1994_v36  ;;  %v870_v53 = vmul.f32 %v1994_v36, %v2275_v58 }
 0x93d   :  { %v822_v34 = vpop.permute.xlu0 %821 }
 0x93e   :  { %v824_v35 = vmul.f32 %v1992_v33, %v822_v34 }
 0x940   :  { %826 = vrot.lane.b32.xlu0 %v824_v35, %s2052_s11 }
 0x941   :  { %v855_v37 = vpop.permute.xlu1 %854 }
 0x942   :  { %v857_v38 = vmul.f32 %v1994_v36, %v855_v37 }
 0x944   :  { %859 = vrot.lane.b32.xlu1 %v857_v38, %s2052_s11 }
 0x9b2   :  { %v827_v39 = vpop.permute.xlu0 %826 }
 0x9b3   :  { %v829_v40 = vadd.f32 %v827_v39, %v708_v22  ;;  %v900_v22 = vunpack.c.l.bf16 %v1735_v21 }
 0x9b5   :  { %1995 = vtanh.f32 %v829_v40 }
 0x9b6   :  { %v860_v41 = vpop.permute.xlu1 %859 }
 0x9b7   :  { %v862_v42 = vadd.f32 %v860_v41, %v711_v25  ;;  %v903_v25 = vunpack.c.l.bf16 %v1736_v23  ;;  %v1743_v23 = vld [vmem:[%s2587_s0 + $0x5] sm:$0x1] }
 0x9b9   :  { %1997 = vtanh.f32 %v862_v42 }
 0x9c2   :  { %v1996_v43 = vpop.eup %1995 }
 0x9c3   :  { %833 = vrot.lane.b32.xlu0 %v1996_v43, %s2054_s17 }
 0x9c6   :  { %v1998_v44 = vpop.eup %1997 }
 0x9c7   :  { %866 = vrot.lane.b32.xlu1 %v1998_v44, %s2054_s17 }
 0xa35   :  { %v834_v46 = vpop.permute.xlu0 %833 }
 0xa36   :  { %v836_v48 = vmul.f32 %v834_v46, %v831_v45 }
 0xa38   :  { %v2312_v49 = vadd.f32 %v837_v47, %v836_v48 }
 0xa39   :  { %v867_v52 = vpop.permute.xlu1 %866 }
 0xa3a   :  { %v869_v54 = vmul.f32 %v867_v52, %v864_v50  ;;  %v904_v56 = vpack.c.bf16 %v2312_v49, %v2312_v49 }
 0xa3c   :  { %v2317_v57 = vadd.f32 %v870_v53, %v869_v54  ;;  %906 = vrot.lane.b32.xlu0 %v904_v56, %s2054_s17 }
 0xa3e   :  { %v951_v59 = vpack.c.bf16 %v2317_v57, %v2317_v57 }
 0xa40   :  { %953 = vrot.lane.b32.xlu1 %v951_v59, %s2054_s17 }
 0xaae   :  { %v907_v60 = vpop.permute.xlu0 %906 }
 0xaaf   :  { %1882 = vmatmul.mubr.msk.bf16.vlgmr.msra.gmra.mxu0 %vm102_vm2, %v907_v60 }
 0xab0   :  { %1894 = vmatpush3.bf16.msra.mxu0 %v2100_v1  ;;  %1897 = vmatprep.mubr.msk.bf16.mxu0 %vm2050_vm1, %v2049_v0 }
 0xab1   :  { %1895 = vmatprep.subr.bf16.mxu0 %v2049_v0 }
 0xab2   :  { %v954_v63 = vpop.permute.xlu1 %953 }
 0xab3   :  { %1890 = vmatmul.mubr.msk.bf16.vlgmr.msra.gmra.mxu1 %vm102_vm2, %v954_v63 }
 0xab4   :  { %1902 = vmatpush3.bf16.msra.mxu1 %v2109_v2  ;;  %1896 = vmatpush3.bf16.msra.mxu0 %v2119_v3 }
 0xab5   :  { %1903 = vmatprep.subr.bf16.mxu1 %v2049_v0  ;;  %1905 = vmatprep.mubr.msk.bf16.mxu1 %vm2050_vm1, %v2049_v0 }
 0xab6   :  { %1909 = vmatprep.subr.bf16.mxu0 %v2049_v0 }
 0xab8   :  { %1904 = vmatpush3.bf16.msra.mxu1 %v2126_v4 }
 0xab9   :  { %1917 = vmatprep.subr.bf16.mxu1 %v2049_v0 }
 0xb6f   :  { %v945_v5 = vpop.f32.mrf.mxu0 }
 0xb70   :  { %v946_v6 = vadd.f32 %v2158_v14, %v945_v5 }
 0xb71   :  { %v1883_v7 = vpop.f32.mrf.mxu0 }
 0xb72   :  { %v1012_v9 = vrot.slane %v946_v6, %v2165_v16  ;;  %v998_v24 = vadd.f32 %v946_v6, %v900_v22 }
 0xb73   :  { %v948_v10 = vpop.f32.mrf.mxu0  ;;  %v992_v11 = vpop.f32.mrf.mxu1 }
 0xb74   :  { %v993_v12 = vadd.f32 %v2163_v15, %v992_v11  ;;  %1013 = vrot.lane.b32.xlu0 %v1012_v9, %s2052_s11  ;;  %v1739_v26 = vmul.f32 -1.442695, %v998_v24  ;;  %v1092_v24 = vunpack.c.l.bf16 %v1743_v23  ;;  %v1752_v23 = vld [vmem:[%s2588_s1 + $0x1] sm:$0x1] }
 0xb75   :  { %v1884_v13 = vpop.f32.mrf.mxu0  ;;  %v1891_v17 = vpop.f32.mrf.mxu1 }
 0xb76   :  { %v1045_v18 = vrot.slane %v993_v12, %v2165_v16  ;;  %v1031_v27 = vadd.f32 %v993_v12, %v903_v25  ;;  %1999 = vpow2.f32 %v1739_v26 }
 0xb77   :  { %v995_v19 = vpop.f32.mrf.mxu1 }
 0xb78   :  { %1046 = vrot.lane.b32.xlu1 %v1045_v18, %s2052_s11  ;;  %v1740_v28 = vmul.f32 -1.442695, %v1031_v27 }
 0xb79   :  { %v1892_v20 = vpop.f32.mrf.mxu1 }
 0xb7a   :  { %2001 = vpow2.f32 %v1740_v28 }
 0xb83   :  { %v2000_v29 = vpop.eup %1999 }
 0xb84   :  { %v1002_v30 = vadd.f32 1.0, %v2000_v29 }
 0xb86   :  { %2003 = vrcp.f32 %v1002_v30 }
 0xb87   :  { %v2002_v31 = vpop.eup %2001 }
 0xb88   :  { %v1035_v32 = vadd.f32 1.0, %v2002_v31 }
 0xb8a   :  { %2005 = vrcp.f32 %v1035_v32 }
 0xb93   :  { %v2004_v33 = vpop.eup %2003 }
 0xb94   :  { %v1023_v45 = vsub.f32 1.0, %v2004_v33  ;;  %v1029_v47 = vmul.f32 %v2004_v33, %v2312_v49 }
 0xb97   :  { %v2006_v36 = vpop.eup %2005 }
 0xb98   :  { %v1056_v52 = vsub.f32 1.0, %v2006_v36  ;;  %v1062_v54 = vmul.f32 %v2006_v36, %v2317_v57 }
 0xbe6   :  { %v1014_v34 = vpop.permute.xlu0 %1013 }
 0xbe7   :  { %v1016_v35 = vmul.f32 %v2004_v33, %v1014_v34 }
 0xbe9   :  { %1018 = vrot.lane.b32.xlu0 %v1016_v35, %s2052_s11 }
 0xbea   :  { %v1047_v37 = vpop.permute.xlu1 %1046 }
 0xbeb   :  { %v1049_v38 = vmul.f32 %v2006_v36, %v1047_v37 }
 0xbed   :  { %1051 = vrot.lane.b32.xlu1 %v1049_v38, %s2052_s11 }
 0xc5b   :  { %v1019_v39 = vpop.permute.xlu0 %1018 }
 0xc5c   :  { %v1021_v40 = vadd.f32 %v1019_v39, %v900_v22 }
 0xc5e   :  { %2007 = vtanh.f32 %v1021_v40 }
 0xc5f   :  { %v1052_v41 = vpop.permute.xlu1 %1051 }
 0xc60   :  { %v1054_v42 = vadd.f32 %v1052_v41, %v903_v25  ;;  %v1744_v25 = vld [vmem:[%s2588_s1 + $0x2] sm:$0x1] }
 0xc61   :  { %v1095_v27 = vunpack.c.l.bf16 %v1744_v25 }
 0xc62   :  { %2009 = vtanh.f32 %v1054_v42 }
 0xc6b   :  { %v2008_v43 = vpop.eup %2007 }
 0xc6c   :  { %1025 = vrot.lane.b32.xlu0 %v2008_v43, %s2054_s17 }
 0xc6f   :  { %v2010_v44 = vpop.eup %2009 }
 0xc70   :  { %1058 = vrot.lane.b32.xlu1 %v2010_v44, %s2054_s17 }
 0xcde   :  { %v1026_v46 = vpop.permute.xlu0 %1025 }
 0xcdf   :  { %v1028_v48 = vmul.f32 %v1026_v46, %v1023_v45 }
 0xce1   :  { %v2354_v50 = vadd.f32 %v1029_v47, %v1028_v48 }
 0xce2   :  { %v1059_v53 = vpop.permute.xlu1 %1058 }
 0xce3   :  { %v1061_v56 = vmul.f32 %v1059_v53, %v1056_v52  ;;  %v1096_v59 = vpack.c.bf16 %v2354_v50, %v2354_v50 }
 0xce5   :  { %v2359_v60 = vadd.f32 %v1062_v54, %v1061_v56  ;;  %1098 = vrot.lane.b32.xlu0 %v1096_v59, %s2054_s17 }
 0xce7   :  { %v1143_v63 = vpack.c.bf16 %v2359_v60, %v2359_v60 }
 0xce9   :  { %1145 = vrot.lane.b32.xlu1 %v1143_v63, %s2054_s17 }
 0xd57   :  { %v1099_v5 = vpop.permute.xlu0 %1098 }
 0xd58   :  { %1898 = vmatmul.mubr.msk.bf16.vlgmr.msra.gmra.mxu0 %vm102_vm2, %v1099_v5 }
 0xd59   :  { %1910 = vmatpush3.bf16.msra.mxu0 %v2100_v1  ;;  %1913 = vmatprep.mubr.msk.bf16.mxu0 %vm2050_vm1, %v2049_v0 }
 0xd5a   :  { %1911 = vmatprep.subr.bf16.mxu0 %v2049_v0 }
 0xd5b   :  { %v1146_v6 = vpop.permute.xlu1 %1145 }
 0xd5c   :  { %1906 = vmatmul.mubr.msk.bf16.vlgmr.msra.gmra.mxu1 %vm102_vm2, %v1146_v6 }
 0xd5d   :  { %1918 = vmatpush3.bf16.msra.mxu1 %v2109_v2  ;;  %1912 = vmatpush3.bf16.msra.mxu0 %v2119_v3 }
 0xd5e   :  { %1919 = vmatprep.subr.bf16.mxu1 %v2049_v0  ;;  %1921 = vmatprep.mubr.msk.bf16.mxu1 %vm2050_vm1, %v2049_v0 }
 0xd5f   :  { %1925 = vmatprep.subr.bf16.mxu0 %v2049_v0 }
 0xd61   :  { %1920 = vmatpush3.bf16.msra.mxu1 %v2126_v4 }
 0xd62   :  { %1933 = vmatprep.subr.bf16.mxu1 %v2049_v0 }
 0xe18   :  { %v1137_v7 = vpop.f32.mrf.mxu0 }
 0xe19   :  { %v1138_v9 = vadd.f32 %v2158_v14, %v1137_v7 }
 0xe1a   :  { %v1899_v10 = vpop.f32.mrf.mxu0 }
 0xe1b   :  { %v1204_v11 = vrot.slane %v1138_v9, %v2165_v16  ;;  %v1190_v26 = vadd.f32 %v1138_v9, %v1092_v24 }
 0xe1c   :  { %v1140_v12 = vpop.f32.mrf.mxu0  ;;  %v1184_v13 = vpop.f32.mrf.mxu1 }
 0xe1d   :  { %v1185_v17 = vadd.f32 %v2163_v15, %v1184_v13  ;;  %1205 = vrot.lane.b32.xlu0 %v1204_v11, %s2052_s11  ;;  %v1747_v28 = vmul.f32 -1.442695, %v1190_v26 }
 0xe1e   :  { %v1900_v18 = vpop.f32.mrf.mxu0  ;;  %v1907_v19 = vpop.f32.mrf.mxu1 }
 0xe1f   :  { %v1237_v20 = vrot.slane %v1185_v17, %v2165_v16  ;;  %v1223_v29 = vadd.f32 %v1185_v17, %v1095_v27  ;;  %2011 = vpow2.f32 %v1747_v28 }
 0xe20   :  { %v1187_v21 = vpop.f32.mrf.mxu1 }
 0xe21   :  { %1238 = vrot.lane.b32.xlu1 %v1237_v20, %s2052_s11  ;;  %v1748_v30 = vmul.f32 -1.442695, %v1223_v29 }
 0xe22   :  { %v1908_v22 = vpop.f32.mrf.mxu1 }
 0xe23   :  { %2013 = vpow2.f32 %v1748_v30 }
 0xe2c   :  { %v2012_v31 = vpop.eup %2011 }
 0xe2d   :  { %v1194_v32 = vadd.f32 1.0, %v2012_v31 }
 0xe2f   :  { %2015 = vrcp.f32 %v1194_v32 }
 0xe30   :  { %v2014_v33 = vpop.eup %2013 }
 0xe31   :  { %v1227_v34 = vadd.f32 1.0, %v2014_v33 }
 0xe33   :  { %2017 = vrcp.f32 %v1227_v34 }
 0xe3c   :  { %v2016_v35 = vpop.eup %2015 }
 0xe3d   :  { %v1215_v47 = vsub.f32 1.0, %v2016_v35  ;;  %v1221_v52 = vmul.f32 %v2016_v35, %v2354_v50 }
 0xe40   :  { %v2018_v38 = vpop.eup %2017 }
 0xe41   :  { %v1248_v56 = vsub.f32 1.0, %v2018_v38  ;;  %v1254_v63 = vmul.f32 %v2018_v38, %v2359_v60 }
 0xe8f   :  { %v1206_v36 = vpop.permute.xlu0 %1205 }
 0xe90   :  { %v1208_v37 = vmul.f32 %v2016_v35, %v1206_v36 }
 0xe92   :  { %1210 = vrot.lane.b32.xlu0 %v1208_v37, %s2052_s11 }
 0xe93   :  { %v1239_v39 = vpop.permute.xlu1 %1238 }
 0xe94   :  { %v1241_v40 = vmul.f32 %v2018_v38, %v1239_v39 }
 0xe96   :  { %1243 = vrot.lane.b32.xlu1 %v1241_v40, %s2052_s11 }
 0xf04   :  { %v1211_v41 = vpop.permute.xlu0 %1210 }
 0xf05   :  { %v1213_v42 = vadd.f32 %v1211_v41, %v1092_v24  ;;  %v1287_v24 = vunpack.c.l.bf16 %v1752_v23 }
 0xf07   :  { %2019 = vtanh.f32 %v1213_v42 }
 0xf08   :  { %v1244_v43 = vpop.permute.xlu1 %1243 }
 0xf09   :  { %v1246_v44 = vadd.f32 %v1244_v43, %v1095_v27 }
 0xf0b   :  { %2021 = vtanh.f32 %v1246_v44 }
 0xf14   :  { %v2020_v45 = vpop.eup %2019 }
 0xf15   :  { %1217 = vrot.lane.b32.xlu0 %v2020_v45, %s2054_s17 }
 0xf18   :  { %v2022_v46 = vpop.eup %2021 }
 0xf19   :  { %1250 = vrot.lane.b32.xlu1 %v2022_v46, %s2054_s17 }
 0xf87   :  { %v1218_v48 = vpop.permute.xlu0 %1217 }
 0xf88   :  { %v1220_v53 = vmul.f32 %v1218_v48, %v1215_v47 }
 0xf8a   :  { %v2396_v54 = vadd.f32 %v1221_v52, %v1220_v53 }
 0xf8b   :  { %v1251_v59 = vpop.permute.xlu1 %1250 }
 0xf8c   :  { %v1253_v5 = vmul.f32 %v1251_v59, %v1248_v56  ;;  %v1288_v6 = vpack.c.bf16 %v2396_v54, %v2396_v54 }
 0xf8e   :  { %v2401_v7 = vadd.f32 %v1254_v63, %v1253_v5  ;;  %1290 = vrot.lane.b32.xlu0 %v1288_v6, %s2054_s17 }
 0xf90   :  { %v1335_v9 = vpack.c.bf16 %v2401_v7, %v2401_v7 }
 0xf92   :  { %1337 = vrot.lane.b32.xlu1 %v1335_v9, %s2054_s17 }
0x1000   :  { %v1291_v10 = vpop.permute.xlu0 %1290 }
0x1001   :  { %1914 = vmatmul.mubr.msk.bf16.vlgmr.msra.gmra.mxu0 %vm102_vm2, %v1291_v10 }
0x1002   :  { %1926 = vmatpush3.bf16.msra.mxu0 %v2100_v1  ;;  %1929 = vmatprep.mubr.msk.bf16.mxu0 %vm2050_vm1, %v2049_v0 }
0x1003   :  { %1927 = vmatprep.subr.bf16.mxu0 %v2049_v0 }
0x1004   :  { %v1338_v11 = vpop.permute.xlu1 %1337 }
0x1005   :  { %1922 = vmatmul.mubr.msk.bf16.vlgmr.msra.gmra.mxu1 %vm102_vm2, %v1338_v11 }
0x1006   :  { %1934 = vmatpush3.bf16.msra.mxu1 %v2109_v2  ;;  %1928 = vmatpush3.bf16.msra.mxu0 %v2119_v3 }
0x1007   :  { %1935 = vmatprep.subr.bf16.mxu1 %v2049_v0  ;;  %1937 = vmatprep.mubr.msk.bf16.mxu1 %vm2050_vm1, %v2049_v0 }
0x100a   :  { %1936 = vmatpush3.bf16.msra.mxu1 %v2126_v4  ;;  %v1751_v4 = vld [vmem:[%s2587_s0 + $0x6] sm:$0x1] }
0x10c1   :  { %v1329_v1 = vpop.f32.mrf.mxu0 }
0x10c2   :  { %v1330_v12 = vadd.f32 %v2158_v14, %v1329_v1  ;;  %v1284_v14 = vunpack.c.l.bf16 %v1751_v4  ;;  %v2047_v1 = vld [vmem:[%s2585_s4] ss:$0 sm:$0xff] }
0x10c3   :  { %v1915_v13 = vpop.f32.mrf.mxu0 }
0x10c4   :  { %v1396_v17 = vrot.slane %v1330_v12, %v2165_v16 }
0x10c5   :  { %v1332_v18 = vpop.f32.mrf.mxu0  ;;  %v1376_v19 = vpop.f32.mrf.mxu1 }
0x10c6   :  { %v1377_v20 = vadd.f32 %v2163_v15, %v1376_v19  ;;  %1397 = vrot.lane.b32.xlu0 %v1396_v17, %s2052_s11  ;;  %v1382_v15 = vadd.f32 %v1330_v12, %v1284_v14 }
0x10c7   :  { %v1916_v2 = vpop.f32.mrf.mxu0  ;;  %v1923_v3 = vpop.f32.mrf.mxu1 }
0x10c8   :  { %v1429_v21 = vrot.slane %v1377_v20, %v2165_v16  ;;  %v1755_v25 = vmul.f32 -1.442695, %v1382_v15  ;;  %v1415_v26 = vadd.f32 %v1377_v20, %v1287_v24  ;;  %v2048_v20 = vld [vmem:[%s2586_s5] ss:$0 sm:$0xff] }
0x10c9   :  { %v1379_v22 = vpop.f32.mrf.mxu1  ;;  %v1477_v15 = vld [vmem:[%s2588_s1] sm:$0x1] }
0x10ca   :  { %1430 = vrot.lane.b32.xlu1 %v1429_v21, %s2052_s11  ;;  %2023 = vpow2.f32 %v1755_v25  ;;  %v1756_v27 = vmul.f32 -1.442695, %v1415_v26  ;;  %v1478_v25 = vunpack.c.l.bf16 %v1477_v15 }
0x10cb   :  { %v1924_v0 = vpop.f32.mrf.mxu1 }
0x10cc   :  { %2025 = vpow2.f32 %v1756_v27 }
0x10d7   :  { %v2024_v28 = vpop.eup %2023 }
0x10d8   :  { %v1386_v29 = vadd.f32 1.0, %v2024_v28 }
0x10d9   :  { %v2026_v30 = vpop.eup %2025 }
0x10da   :  { %2027 = vrcp.f32 %v1386_v29  ;;  %v1419_v31 = vadd.f32 1.0, %v2026_v30 }
0x10dc   :  { %2029 = vrcp.f32 %v1419_v31 }
0x10e7   :  { %v2028_v32 = vpop.eup %2027 }
0x10e8   :  { %v1407_v44 = vsub.f32 1.0, %v2028_v32  ;;  %v1413_v46 = vmul.f32 %v2028_v32, %v2396_v54 }
0x10e9   :  { %v2030_v35 = vpop.eup %2029 }
0x10ea   :  { %v1440_v52 = vsub.f32 1.0, %v2030_v35  ;;  %v1446_v56 = vmul.f32 %v2030_v35, %v2401_v7 }
0x1138   :  { %v1398_v33 = vpop.permute.xlu0 %1397 }
0x1139   :  { %v1400_v34 = vmul.f32 %v2028_v32, %v1398_v33 }
0x113b   :  { %1402 = vrot.lane.b32.xlu0 %v1400_v34, %s2052_s11 }
0x113c   :  { %v1431_v36 = vpop.permute.xlu1 %1430 }
0x113d   :  { %v1433_v37 = vmul.f32 %v2030_v35, %v1431_v36 }
0x113f   :  { %1435 = vrot.lane.b32.xlu1 %v1433_v37, %s2052_s11 }
0x11ad   :  { %v1403_v38 = vpop.permute.xlu0 %1402 }
0x11ae   :  { %v1405_v39 = vadd.f32 %v1403_v38, %v1284_v14  ;;  %v1759_v14 = vld [vmem:[%s2587_s0 + $0x7] sm:$0x1] }
0x11af   :  { %v1476_v23 = vunpack.c.l.bf16 %v1759_v14 }
0x11b0   :  { %2031 = vtanh.f32 %v1405_v39 }
0x11b1   :  { %v1436_v40 = vpop.permute.xlu1 %1435 }
0x11b2   :  { %v1438_v41 = vadd.f32 %v1436_v40, %v1287_v24 }
0x11b4   :  { %2033 = vtanh.f32 %v1438_v41 }
0x11bd   :  { %v2032_v42 = vpop.eup %2031 }
0x11be   :  { %1409 = vrot.lane.b32.xlu0 %v2032_v42, %s2054_s17 }
0x11c1   :  { %v2034_v43 = vpop.eup %2033 }
0x11c2   :  { %1442 = vrot.lane.b32.xlu1 %v2034_v43, %s2054_s17 }
0x1230   :  { %v1410_v45 = vpop.permute.xlu0 %1409 }
0x1231   :  { %v1412_v47 = vmul.f32 %v1410_v45, %v1407_v44  ;;  %v303_v44 = vrot.slane %v2187_v61, %v2165_v16  ;;  %v508_v61 = vrot.slane %v2233_v62, %v2165_v16  ;;  %v892_v62 = vrot.slane %v2317_v57, %v2165_v16 }
0x1232   :  { %v1276_v57 = vrot.slane %v2401_v7, %v2165_v16 }
0x1233   :  { %v2436_v48 = vadd.f32 %v1413_v46, %v1412_v47  ;;  %v495_v46 = vrot.slane %v2228_v55, %v2165_v16  ;;  %v316_v47 = vrot.slane %v2191_v8, %v2165_v16  ;;  %v879_v55 = vrot.slane %v2312_v49, %v2165_v16 }
0x1234   :  { %v1443_v53 = vpop.permute.xlu1 %1442  ;;  %v700_v8 = vrot.slane %v2275_v58, %v2165_v16  ;;  %v1263_v49 = vrot.slane %v2396_v54, %v2165_v16  ;;  %v1084_v58 = vrot.slane %v2359_v60, %v2165_v16 }
0x1235   :  { %v1445_v59 = vmul.f32 %v1443_v53, %v1440_v52  ;;  %v1479_v63 = vpack.c.bf16 %v2436_v48, %v2436_v48  ;;  %v687_v52 = vrot.slane %v2270_v51, %v2165_v16  ;;  %v1071_v51 = vrot.slane %v2354_v50, %v2165_v16 }
0x1236   :  { %v1455_v50 = vrot.slane %v2436_v48, %v2165_v16 }
0x1237   :  { %v2441_v5 = vadd.f32 %v1446_v56, %v1445_v59  ;;  %1481 = vrot.lane.b32.xlu0 %v1479_v63, %s2054_s17 }
0x1239   :  { %v1526_v6 = vpack.c.bf16 %v2441_v5, %v2441_v5  ;;  %v1468_v54 = vrot.slane %v2441_v5, %v2165_v16 }
0x123b   :  { %1528 = vrot.lane.b32.xlu1 %v1526_v6, %s2054_s17 }
0x12a9   :  { %v1482_v9 = vpop.permute.xlu0 %1481 }
0x12aa   :  { %1930 = vmatmul.mubr.msk.bf16.vlgmr.msra.gmra.mxu0 %vm102_vm2, %v1482_v9 }
0x12ad   :  { %v1529_v10 = vpop.permute.xlu1 %1528 }
0x12ae   :  { %1938 = vmatmul.mubr.msk.bf16.vlgmr.msra.gmra.mxu1 %vm102_vm2, %v1529_v10 }
0x136a   :  { %v1520_v11 = vpop.f32.mrf.mxu0 }
0x136b   :  { %v1521_v12 = vadd.f32 %v2047_v1, %v1520_v11 }
0x136c   :  { %v1931_v13 = vpop.f32.mrf.mxu0 }
0x136d   :  { %v1587_v17 = vrot.slane %v1521_v12, %v2165_v16  ;;  %v1573_v24 = vadd.f32 %v1521_v12, %v1476_v23 }
0x136e   :  { %v1523_v18 = vpop.f32.mrf.mxu0  ;;  %v1567_v19 = vpop.f32.mrf.mxu1 }
0x136f   :  { %v1568_v2 = vadd.f32 %v2048_v20, %v1567_v19  ;;  %1588 = vrot.lane.b32.xlu0 %v1587_v17, %s2052_s11  ;;  %v1762_v26 = vmul.f32 -1.442695, %v1573_v24 }
0x1370   :  { %v1932_v3 = vpop.f32.mrf.mxu0  ;;  %v1939_v21 = vpop.f32.mrf.mxu1 }
0x1371   :  { %v1620_v22 = vrot.slane %v1568_v2, %v2165_v16  ;;  %v1606_v27 = vadd.f32 %v1568_v2, %v1478_v25  ;;  %2035 = vpow2.f32 %v1762_v26 }
0x1372   :  { %v1570_v0 = vpop.f32.mrf.mxu1 }
0x1373   :  { %1621 = vrot.lane.b32.xlu1 %v1620_v22, %s2052_s11  ;;  %v1763_v28 = vmul.f32 -1.442695, %v1606_v27 }
0x1374   :  { %v1940_v4 = vpop.f32.mrf.mxu1 }
0x1375   :  { %2037 = vpow2.f32 %v1763_v28 }
0x137e   :  { %v2036_v29 = vpop.eup %2035 }
0x137f   :  { %v1577_v30 = vadd.f32 1.0, %v2036_v29 }
0x1381   :  { %2039 = vrcp.f32 %v1577_v30 }
0x1382   :  { %v2038_v31 = vpop.eup %2037 }
0x1383   :  { %v1610_v32 = vadd.f32 1.0, %v2038_v31 }
0x1385   :  { %2041 = vrcp.f32 %v1610_v32 }
0x138e   :  { %v2040_v33 = vpop.eup %2039 }
0x138f   :  { %v1598_v60 = vsub.f32 1.0, %v2040_v33  ;;  %v1604_v56 = vmul.f32 %v2040_v33, %v2436_v48 }
0x1392   :  { %v2042_v36 = vpop.eup %2041 }
0x1393   :  { %v1631_v6 = vsub.f32 1.0, %v2042_v36  ;;  %v1637_v7 = vmul.f32 %v2042_v36, %v2441_v5 }
0x13e1   :  { %v1589_v34 = vpop.permute.xlu0 %1588 }
0x13e2   :  { %v1591_v35 = vmul.f32 %v2040_v33, %v1589_v34 }
0x13e4   :  { %1593 = vrot.lane.b32.xlu0 %v1591_v35, %s2052_s11 }
0x13e5   :  { %v1622_v37 = vpop.permute.xlu1 %1621 }
0x13e6   :  { %v1624_v38 = vmul.f32 %v2042_v36, %v1622_v37 }
0x13e8   :  { %1626 = vrot.lane.b32.xlu1 %v1624_v38, %s2052_s11 }
0x1456   :  { %v1594_v39 = vpop.permute.xlu0 %1593 }
0x1457   :  { %v1596_v40 = vadd.f32 %v1594_v39, %v1476_v23 }
0x1459   :  { %2043 = vtanh.f32 %v1596_v40 }
0x145a   :  { %v1627_v41 = vpop.permute.xlu1 %1626 }
0x145b   :  { %v1629_v42 = vadd.f32 %v1627_v41, %v1478_v25 }
0x145d   :  { %2045 = vtanh.f32 %v1629_v42 }
0x1466   :  { %v2044_v43 = vpop.eup %2043 }
0x1467   :  { %1600 = vrot.lane.b32.xlu0 %v2044_v43, %s2054_s17 }
0x146a   :  { %v2046_v45 = vpop.eup %2045 }
0x146b   :  { %304 = vrot.lane.b32.xlu0 %v303_v44, %s2054_s17  ;;  %1633 = vrot.lane.b32.xlu1 %v2046_v45, %s2054_s17 }
0x146f   :  { %496 = vrot.lane.b32.xlu0 %v495_v46, %s2054_s17  ;;  %317 = vrot.lane.b32.xlu1 %v316_v47, %s2054_s17 }
0x1473   :  { %688 = vrot.lane.b32.xlu0 %v687_v52, %s2054_s17  ;;  %509 = vrot.lane.b32.xlu1 %v508_v61, %s2054_s17 }
0x1477   :  { %880 = vrot.lane.b32.xlu0 %v879_v55, %s2054_s17  ;;  %701 = vrot.lane.b32.xlu1 %v700_v8, %s2054_s17 }
0x147b   :  { %1072 = vrot.lane.b32.xlu0 %v1071_v51, %s2054_s17  ;;  %893 = vrot.lane.b32.xlu1 %v892_v62, %s2054_s17 }
0x147f   :  { %1264 = vrot.lane.b32.xlu0 %v1263_v49, %s2054_s17  ;;  %1085 = vrot.lane.b32.xlu1 %v1084_v58, %s2054_s17 }
0x1483   :  { %1456 = vrot.lane.b32.xlu0 %v1455_v50, %s2054_s17  ;;  %1277 = vrot.lane.b32.xlu1 %v1276_v57, %s2054_s17 }
0x1487   :  { %1469 = vrot.lane.b32.xlu1 %v1468_v54, %s2054_s17 }
0x14d9   :  { %v1601_v53 = vpop.permute.xlu0 %1600 }
0x14da   :  { %v1603_v59 = vmul.f32 %v1601_v53, %v1598_v60 }
0x14dc   :  { %v1605_v63 = vadd.f32 %v1604_v56, %v1603_v59 }
0x14dd   :  { %v305_v9 = vpop.permute.xlu0 %304  ;;  %v1634_v10 = vpop.permute.xlu1 %1633 }
0x14de   :  { %308 = vst.msk [vmem:[%s2589_s6] sm:$0x3] %vm63_vm0, %v305_v9  ;;  %v1636_v11 = vmul.f32 %v1634_v10, %v1631_v6  ;;  %v1646_v1 = vrot.slane %v1605_v63, %v2165_v16 }
0x14e0   :  { %v1638_v12 = vadd.f32 %v1637_v7, %v1636_v11  ;;  %1647 = vrot.lane.b32.xlu0 %v1646_v1, %s2054_s17 }
0x14e1   :  { %v497_v13 = vpop.permute.xlu0 %496  ;;  %v318_v48 = vpop.permute.xlu1 %317 }
0x14e2   :  { %1717 = vst.msk [vmem:[%s2589_s6 + $0x2] sm:$0x3] %vm63_vm0, %v497_v13  ;;  %1710 = vst.msk [vmem:[%s2590_s7 + $0xe] sm:$0x3] %vm63_vm0, %v318_v48  ;;  %v1659_v5 = vrot.slane %v1638_v12, %v2165_v16 }
0x14e4   :  { %1660 = vrot.lane.b32.xlu1 %v1659_v5, %s2054_s17 }
0x14e5   :  { %v689_v17 = vpop.permute.xlu0 %688  ;;  %v510_v18 = vpop.permute.xlu1 %509 }
0x14e6   :  { %1725 = vst.msk [vmem:[%s2589_s6 + $0x4] sm:$0x3] %vm63_vm0, %v689_v17  ;;  %1718 = vst.msk [vmem:[%s2590_s7 + $0xc] sm:$0x3] %vm63_vm0, %v510_v18 }
0x14e9   :  { %v881_v19 = vpop.permute.xlu0 %880  ;;  %v702_v20 = vpop.permute.xlu1 %701 }
0x14ea   :  { %1733 = vst.msk [vmem:[%s2589_s6 + $0x6] sm:$0x3] %vm63_vm0, %v881_v19  ;;  %1726 = vst.msk [vmem:[%s2590_s7 + $0xa] sm:$0x3] %vm63_vm0, %v702_v20 }
0x14ed   :  { %v1073_v16 = vpop.permute.xlu0 %1072  ;;  %v894_v2 = vpop.permute.xlu1 %893 }
0x14ee   :  { %1741 = vst.msk [vmem:[%s2589_s6 + $0x8] sm:$0x3] %vm63_vm0, %v1073_v16  ;;  %1734 = vst.msk [vmem:[%s2590_s7 + $0x8] sm:$0x3] %vm63_vm0, %v894_v2 }
0x14f1   :  { %v1265_v3 = vpop.permute.xlu0 %1264  ;;  %v1086_v21 = vpop.permute.xlu1 %1085 }
0x14f2   :  { %1749 = vst.msk [vmem:[%s2589_s6 + $0xa] sm:$0x3] %vm63_vm0, %v1265_v3  ;;  %1742 = vst.msk [vmem:[%s2590_s7 + $0x6] sm:$0x3] %vm63_vm0, %v1086_v21 }
0x14f5   :  { %v1457_v22 = vpop.permute.xlu0 %1456  ;;  %v1278_v0 = vpop.permute.xlu1 %1277 }
0x14f6   :  { %1757 = vst.msk [vmem:[%s2589_s6 + $0xc] sm:$0x3] %vm63_vm0, %v1457_v22  ;;  %1750 = vst.msk [vmem:[%s2590_s7 + $0x4] sm:$0x3] %vm63_vm0, %v1278_v0 }
0x14f9   :  { %v1470_v4 = vpop.permute.xlu1 %1469 }
0x14fa   :  { %1758 = vst.msk [vmem:[%s2590_s7 + $0x2] sm:$0x3] %vm63_vm0, %v1470_v4 }
0x1552   :  { %v1648_v14 = vpop.permute.xlu0 %1647 }
0x1553   :  { %1764 = vst.msk [vmem:[%s2589_s6 + $0xe] sm:$0x3] %vm63_vm0, %v1648_v14  ;;  %1664 = vst.msk [vmem:[#allocation2] sm:$0x3] %vm63_vm0, %v1648_v14 }
0x1556   :  { %v1661_v23 = vpop.permute.xlu1 %1660 }
0x1557   :  { %1663 = vst.msk [vmem:[%s2590_s7] sm:$0x3] %vm63_vm0, %v1661_v23  ;;  %1665 = vst.msk [vmem:[#allocation3] sm:$0x3] %vm63_vm0, %v1661_v23 }

</bundles_post_ra>
